<compile_context>
chip_gen: v7x
topology: tpu7x:2x2x1
jax: 0.10.0
libtpu: 0.0.40
codegen_flags: <defaults>
</compile_context>

<pallas_src>
import math
import functools

import jax
import jax.numpy as jnp
from jax.experimental import pallas as pl
from jax.experimental.pallas import tpu as pltpu


# ---------------- small helpers ----------------

def _row_tile(n, target):
    """Largest row tile <= target that divides n (multiple of 8), else full n."""
    if n <= target:
        return n
    for t in range(target, 7, -8):
        if n % t == 0:
            return t
    return n


def _lane_tile(n, target):
    """Largest lane tile (multiple of 128) <= target dividing n (n is a 128-multiple)."""
    t = max(128, (min(n, target) // 128) * 128)
    while n % t:
        t -= 128
    return t


def _vmem_limit(estimate_bytes):
    """Double-buffered blocks + headroom, clamped to what v7x (64 MiB physical) allows."""
    return int(min(64 << 20, max(2 * estimate_bytes + (4 << 20), 16 << 20)))


def _rep(shape):
    """Weight/bias block: whole array, constant across the 2-D grid."""
    return pl.BlockSpec(shape, lambda i, j: (0, 0))


def _add_layer_norm(x, y, gamma, beta, eps):
    z = x + y
    mean = jnp.mean(z, axis=-1, keepdims=True)
    var = jnp.mean(jnp.square(z - mean), axis=-1, keepdims=True)
    return (z - mean) * jax.lax.rsqrt(var + eps) * gamma + beta


# ---------------- fused Pallas kernels ----------------

def _attn_block_kernel(xq_ref, xkv_ref, wq_ref, bq_ref, wk_ref, bk_ref,
                       wv_ref, bv_ref, wo_ref, bo_ref, g_ref, bln_ref, o_ref,
                       *, heads, scale, eps, causal):
    xq = xq_ref[...]                                   # (tq, D)  f32
    xkv = xkv_ref[...]                                 # (tk, D)  f32
    tq, D = xq.shape
    tk = xkv.shape[0]
    dh = D // heads

    xq_b = xq.astype(jnp.bfloat16)
    xkv_b = xkv.astype(jnp.bfloat16)

    # Separate Q/K/V projections: bf16 operands, f32 accumulation, lane-aligned outputs.
    q = jnp.dot(xq_b, wq_ref[...], preferred_element_type=jnp.float32) + bq_ref[...]
    k = jnp.dot(xkv_b, wk_ref[...], preferred_element_type=jnp.float32) + bk_ref[...]
    v = jnp.dot(xkv_b, wv_ref[...], preferred_element_type=jnp.float32) + bv_ref[...]

    # Head-batched SDPA: one batched dot_general for scores, one for context.
    qh = jnp.swapaxes(q.reshape(tq, heads, dh), 0, 1).astype(jnp.bfloat16)   # (H,tq,dh)
    kh = jnp.swapaxes(k.reshape(tk, heads, dh), 0, 1).astype(jnp.bfloat16)   # (H,tk,dh)
    vh = jnp.swapaxes(v.reshape(tk, heads, dh), 0, 1).astype(jnp.bfloat16)   # (H,tk,dh)

    s = jnp.einsum('hqd,hkd->hqk', qh, kh,
                   preferred_element_type=jnp.float32) * scale               # (H,tq,tk)
    if causal:
        # Causal mask generated in-kernel: no (T,T) mask DMA / VMEM residency.
        q0 = pl.program_id(1) * tq
        row = jax.lax.broadcasted_iota(jnp.int32, (tq, tk), 0) + q0
        col = jax.lax.broadcasted_iota(jnp.int32, (tq, tk), 1)
        s = s + jnp.where(col <= row, 0.0, -1e9)[None, :, :]

    s = s - jnp.max(s, axis=-1, keepdims=True)
    p = jnp.exp(s)
    p = p * pl.reciprocal(jnp.sum(p, axis=-1, keepdims=True), approx=True)

    ctx = jnp.einsum('hqk,hkd->hqd', p.astype(jnp.bfloat16), vh,
                     preferred_element_type=jnp.float32)                     # (H,tq,dh)
    ctx = jnp.swapaxes(ctx, 0, 1).reshape(tq, D)

    proj = jnp.dot(ctx.astype(jnp.bfloat16), wo_ref[...],
                   preferred_element_type=jnp.float32) + bo_ref[...]
    o_ref[...] = _add_layer_norm(xq, proj, g_ref[...], bln_ref[...], eps)


def _ffn_block_kernel(x_ref, w1_ref, b1_ref, w2_ref, b2_ref, g_ref, bln_ref, o_ref,
                      *, eps):
    x = x_ref[...]                                                           # (tr, D) f32
    h = jnp.dot(x.astype(jnp.bfloat16), w1_ref[...],
                preferred_element_type=jnp.float32) + b1_ref[...]
    h = jnp.maximum(h, 0.0)
    ff = jnp.dot(h.astype(jnp.bfloat16), w2_ref[...],
                 preferred_element_type=jnp.float32) + b2_ref[...]
    o_ref[...] = _add_layer_norm(x, ff, g_ref[...], bln_ref[...], eps)


def _out_head_kernel(x_ref, w_ref, b_ref, o_ref):
    logits = jnp.dot(x_ref[...].astype(jnp.bfloat16), w_ref[...],
                     preferred_element_type=jnp.float32) + b_ref[...]        # (T, tv)
    # nn.Softmax(dim=1): normalize over the sequence axis (axis 0 of this block);
    # vocab columns are independent, so vocab tiling needs no cross-tile reduction.
    m = jnp.max(logits, axis=0, keepdims=True)
    e = jnp.exp(logits - m)
    o_ref[...] = e / jnp.sum(e, axis=0, keepdims=True)    # exact divide for final output


# ---------------- pallas_call wrappers ----------------

def attention_block(x_q, x_kv, p, heads, eps, causal):
    """x_q: (B, Tq, D) query stream, x_kv: (B, Tk, D) key/value stream.
    Fused QKV projections + MHA + out proj + residual + layernorm."""
    B, Tq, D = x_q.shape
    Tk = x_kv.shape[1]
    bq = _row_tile(Tq, 128)
    scale = 1.0 / math.sqrt(D // heads)
    # TODO(synk): K/V are re-projected per Tq tile; for very long sequences on v7x,
    # pre-project K/V in a separate kernel and flash-loop over Tk instead.
    est = ((2 * bq + Tk) * D * 4                 # xq block, out block, xkv block (f32)
           + 4 * D * D * 2 + 6 * D * 4           # 4 bf16 weight mats, 6 f32 (1,D) vectors
           + 3 * (bq + 2 * Tk) * D * 4           # q/k/v intermediates (rough)
           + 2 * heads * bq * Tk * 4)            # scores + probs (f32)
    return pl.pallas_call(
        functools.partial(_attn_block_kernel, heads=heads, scale=scale,
                          eps=eps, causal=causal),
        out_shape=jax.ShapeDtypeStruct((B, Tq, D), jnp.float32),
        grid=(B, Tq // bq),
        in_specs=[
            pl.BlockSpec((pl.Squeezed(), bq, D), lambda b, q: (b, q, 0)),
            pl.BlockSpec((pl.Squeezed(), Tk, D), lambda b, q: (b, 0, 0)),
            _rep((D, D)), _rep((1, D)),
            _rep((D, D)), _rep((1, D)),
            _rep((D, D)), _rep((1, D)),
            _rep((D, D)), _rep((1, D)),
            _rep((1, D)), _rep((1, D)),
        ],
        out_specs=pl.BlockSpec((pl.Squeezed(), bq, D), lambda b, q: (b, q, 0)),
        compiler_params=pltpu.CompilerParams(
            dimension_semantics=("parallel", "parallel"),
            vmem_limit_bytes=_vmem_limit(est)),
    )(x_q, x_kv, p["wq"], p["bq"], p["wk"], p["bk"], p["wv"], p["bv"],
      p["wo"], p["bo"], p["ln_g"], p["ln_b"])


def ffn_block(x, p, eps):
    """x: (B, T, D). Fused w1 @ ReLU @ w2 + residual + layernorm, row-tiled."""
    B, T, D = x.shape
    Dff = p["w1"].shape[1]
    tr = _row_tile(T, 256)
    est = (2 * tr * D * 4 + 2 * D * Dff * 2 + (Dff + 3 * D) * 4 + 2 * tr * Dff * 4)
    return pl.pallas_call(
        functools.partial(_ffn_block_kernel, eps=eps),
        out_shape=jax.ShapeDtypeStruct((B, T, D), jnp.float32),
        grid=(B, T // tr),
        in_specs=[
            pl.BlockSpec((pl.Squeezed(), tr, D), lambda b, r: (b, r, 0)),
            _rep((D, Dff)), _rep((1, Dff)),
            _rep((Dff, D)), _rep((1, D)),
            _rep((1, D)), _rep((1, D)),
        ],
        out_specs=pl.BlockSpec((pl.Squeezed(), tr, D), lambda b, r: (b, r, 0)),
        compiler_params=pltpu.CompilerParams(
            dimension_semantics=("parallel", "parallel"),
            vmem_limit_bytes=_vmem_limit(est)),
    )(x, p["w1"], p["b1"], p["w2"], p["b2"], p["ln_g"], p["ln_b"])


def output_head(x, w_pad, b_pad, v_true):
    """Final linear + softmax(dim=1). w_pad: (D, Vp) bf16 with Vp a multiple of 128."""
    B, T, D = x.shape
    Vp = w_pad.shape[1]
    tv = _lane_tile(Vp, 2048)
    est = T * D * 4 + D * tv * 2 + tv * 4 + 2 * T * tv * 4
    out = pl.pallas_call(
        _out_head_kernel,
        out_shape=jax.ShapeDtypeStruct((B, T, Vp), jnp.float32),
        grid=(B, Vp // tv),
        in_specs=[
            pl.BlockSpec((pl.Squeezed(), T, D), lambda b, v: (b, 0, 0)),
            pl.BlockSpec((D, tv), lambda b, v: (0, v)),
            pl.BlockSpec((1, tv), lambda b, v: (0, v)),
        ],
        out_specs=pl.BlockSpec((pl.Squeezed(), T, tv), lambda b, v: (b, 0, v)),
        compiler_params=pltpu.CompilerParams(
            dimension_semantics=("parallel", "parallel"),
            vmem_limit_bytes=_vmem_limit(est)),
    )(x, w_pad, b_pad)
    return out[..., :v_true]


# ---------------- model glue (plain JAX) ----------------

def positional_encoding(max_len, d_model):
    pos = jnp.arange(max_len, dtype=jnp.float32)[:, None]
    i = jnp.arange(0, d_model, 2, dtype=jnp.float32)
    angle = pos / jnp.power(10000.0, i / d_model)
    pe = jnp.zeros((max_len, d_model), jnp.float32)
    pe = pe.at[:, 0::2].set(jnp.sin(angle))
    pe = pe.at[:, 1::2].set(jnp.cos(angle))
    return pe


def embed(tokens, table, pe, d_model):
    B, T = tokens.shape
    x = jnp.take(table, tokens, axis=0) * math.sqrt(d_model)   # (B, T, D)
    return x + pe[None, :T, :]


def encoder_forward(src, params, cfg):
    x = embed(src, params["src_emb"], params["pe"], cfg["d_model"])
    # TODO(synk): source pad-token key-padding mask of the reference TransformerEncoder is
    # not reproduced; encoder self-attention runs unmasked.
    for lp in params["enc_layers"]:
        x = attention_block(x, x, lp["attn"], cfg["heads"], cfg["eps"], causal=False)
        x = ffn_block(x, lp["ffn"], cfg["eps"])
    return x


def decoder_forward(tgt, memory, params, cfg):
    x = embed(tgt, params["tgt_emb"], params["pe"], cfg["d_model"])
    for lp in params["dec_layers"]:
        # mask_for_self_attn (causal) is generated inside the kernel via iota compare.
        x = attention_block(x, x, lp["self_attn"], cfg["heads"], cfg["eps"], causal=True)
        # TODO(synk): mask_for_src_to_tgt is assumed all-ones (no masking); a non-trivial
        # user mask would need an additive-mask input path restored in the kernel.
        x = attention_block(x, memory, lp["cross_attn"], cfg["heads"], cfg["eps"],
                            causal=False)
        x = ffn_block(x, lp["ffn"], cfg["eps"])
    return x


def transformer_forward(src, tgt, params, cfg):
    # TODO(synk): dropout (rate 0.1) is omitted (identity), i.e. eval-mode semantics.
    mem = encoder_forward(src, params, cfg)
    dec = decoder_forward(tgt, mem, params, cfg)
    return output_head(dec, params["out_w"], params["out_b"], cfg["tgt_vocab"])


# ---------------- deterministic parameter init ----------------

def init_params(key, cfg):
    d_model, d_ff, N = cfg["d_model"], cfg["d_ff"], cfg["N"]
    keys = iter(jax.random.split(key, 1024))

    def dense(fan_in, fan_out):
        w = jax.random.normal(next(keys), (fan_in, fan_out), jnp.float32) * 0.02
        return w.astype(jnp.bfloat16), jnp.zeros((1, fan_out), jnp.float32)

    def ln():
        return jnp.ones((1, d_model), jnp.float32), jnp.zeros((1, d_model), jnp.float32)

    def attn_params():
        wq, bq = dense(d_model, d_model)
        wk, bk = dense(d_model, d_model)
        wv, bv = dense(d_model, d_model)
        wo, bo = dense(d_model, d_model)
        g, b = ln()
        return {"wq": wq, "bq": bq, "wk": wk, "bk": bk, "wv": wv, "bv": bv,
                "wo": wo, "bo": bo, "ln_g": g, "ln_b": b}

    def ffn_params():
        w1, b1 = dense(d_model, d_ff)
        w2, b2 = dense(d_ff, d_model)
        g, b = ln()
        return {"w1": w1, "b1": b1, "w2": w2, "b2": b2, "ln_g": g, "ln_b": b}

    src_emb = jax.random.normal(next(keys), (cfg["src_vocab"], d_model), jnp.float32) * 0.02
    tgt_emb = jax.random.normal(next(keys), (cfg["tgt_vocab"], d_model), jnp.float32) * 0.02
    src_emb = src_emb.at[cfg["pad_idx"]].set(0.0)
    tgt_emb = tgt_emb.at[cfg["pad_idx"]].set(0.0)

    enc_layers = [{"attn": attn_params(), "ffn": ffn_params()} for _ in range(N)]
    dec_layers = [{"self_attn": attn_params(), "cross_attn": attn_params(),
                   "ffn": ffn_params()} for _ in range(N)]

    # Output head: pad vocab to a multiple of 128 for lane-dense stores; slice outside.
    V = cfg["tgt_vocab"]
    Vp = ((V + 127) // 128) * 128
    out_w = jax.random.normal(next(keys), (d_model, V), jnp.float32) * 0.02
    out_w = jnp.pad(out_w, ((0, 0), (0, Vp - V))).astype(jnp.bfloat16)
    out_b = jnp.zeros((1, Vp), jnp.float32)

    return {
        "src_emb": src_emb, "tgt_emb": tgt_emb,
        "pe": positional_encoding(cfg["max_len"], d_model),
        "enc_layers": enc_layers, "dec_layers": dec_layers,
        "out_w": out_w, "out_b": out_b,
    }


if __name__ == "__main__":
    cfg = dict(src_vocab=32, tgt_vocab=32, d_model=64, heads=4, d_ff=128,
               N=2, max_len=8, eps=1e-5, pad_idx=0)
    key = jax.random.PRNGKey(0)
    pkey, skey, tkey = jax.random.split(key, 3)
    params = init_params(pkey, cfg)

    B, T = 2, cfg["max_len"]
    src = jax.random.randint(skey, (B, T), 1, cfg["src_vocab"], dtype=jnp.int32)
    tgt = jax.random.randint(tkey, (B, T), 1, cfg["tgt_vocab"], dtype=jnp.int32)

    fwd = jax.jit(lambda s, t, p: transformer_forward(s, t, p, cfg))
    out = jax.block_until_ready(fwd(src, tgt, params))

    assert out.shape == (B, T, cfg["tgt_vocab"])
    assert bool(jnp.all(jnp.isfinite(out)))
    print("KERNEL_OK")
</pallas_src>

<mosaic_0001>
module attributes {stable_mosaic.version = 11 : i64} {
  func.func @_attn_block_kernel(%arg0: i32, %arg1: i32, %arg2: memref<1x8x64xf32, #tpu.memory_space<vmem>>, %arg3: memref<1x8x64xf32, #tpu.memory_space<vmem>>, %arg4: memref<64x64xbf16, #tpu.memory_space<vmem>>, %arg5: memref<1x64xf32, #tpu.memory_space<vmem>>, %arg6: memref<64x64xbf16, #tpu.memory_space<vmem>>, %arg7: memref<1x64xf32, #tpu.memory_space<vmem>>, %arg8: memref<64x64xbf16, #tpu.memory_space<vmem>>, %arg9: memref<1x64xf32, #tpu.memory_space<vmem>>, %arg10: memref<64x64xbf16, #tpu.memory_space<vmem>>, %arg11: memref<1x64xf32, #tpu.memory_space<vmem>>, %arg12: memref<1x64xf32, #tpu.memory_space<vmem>>, %arg13: memref<1x64xf32, #tpu.memory_space<vmem>>, %arg14: memref<1x8x64xf32, #tpu.memory_space<vmem>>) attributes {dimension_semantics = [#tpu.dimension_semantics<parallel>, #tpu.dimension_semantics<parallel>], iteration_bounds = array<i64: 2, 1>, scalar_prefetch = 0 : i64, scratch_operands = 0 : i64, tpu.core_type = #tpu.core_type<tc>, window_params = [{transform_indices = @transform_0, window_bounds = array<i64: 1, 8, 64>}, {transform_indices = @transform_1, window_bounds = array<i64: 1, 8, 64>}, {pipeline_mode = #tpu.pipeline_mode<synchronous>, transform_indices = @transform_2, window_bounds = array<i64: 64, 64>}, {pipeline_mode = #tpu.pipeline_mode<synchronous>, transform_indices = @transform_3, window_bounds = array<i64: 1, 64>}, {pipeline_mode = #tpu.pipeline_mode<synchronous>, transform_indices = @transform_4, window_bounds = array<i64: 64, 64>}, {pipeline_mode = #tpu.pipeline_mode<synchronous>, transform_indices = @transform_5, window_bounds = array<i64: 1, 64>}, {pipeline_mode = #tpu.pipeline_mode<synchronous>, transform_indices = @transform_6, window_bounds = array<i64: 64, 64>}, {pipeline_mode = #tpu.pipeline_mode<synchronous>, transform_indices = @transform_7, window_bounds = array<i64: 1, 64>}, {pipeline_mode = #tpu.pipeline_mode<synchronous>, transform_indices = @transform_8, window_bounds = array<i64: 64, 64>}, {pipeline_mode = #tpu.pipeline_mode<synchronous>, transform_indices = @transform_9, window_bounds = array<i64: 1, 64>}, {pipeline_mode = #tpu.pipeline_mode<synchronous>, transform_indices = @transform_10, window_bounds = array<i64: 1, 64>}, {pipeline_mode = #tpu.pipeline_mode<synchronous>, transform_indices = @transform_11, window_bounds = array<i64: 1, 64>}, {transform_indices = @transform_12, window_bounds = array<i64: 1, 8, 64>}]} {
    %c0 = arith.constant 0 : index
    %c0_0 = arith.constant 0 : index
    %c0_1 = arith.constant 0 : index
    %0 = vector.load %arg2[%c0, %c0_0, %c0_1] : memref<1x8x64xf32, #tpu.memory_space<vmem>>, vector<1x8x64xf32>
    %1 = vector.shape_cast %0 : vector<1x8x64xf32> to vector<8x64xf32>
    %c0_2 = arith.constant 0 : index
    %c0_3 = arith.constant 0 : index
    %c0_4 = arith.constant 0 : index
    %2 = vector.load %arg3[%c0_2, %c0_3, %c0_4] : memref<1x8x64xf32, #tpu.memory_space<vmem>>, vector<1x8x64xf32>
    %3 = vector.shape_cast %2 : vector<1x8x64xf32> to vector<8x64xf32>
    %4 = arith.truncf %1 : vector<8x64xf32> to vector<8x64xbf16>
    %5 = arith.truncf %3 : vector<8x64xf32> to vector<8x64xbf16>
    %c0_5 = arith.constant 0 : index
    %c0_6 = arith.constant 0 : index
    %6 = vector.load %arg4[%c0_5, %c0_6] : memref<64x64xbf16, #tpu.memory_space<vmem>>, vector<64x64xbf16>
    %cst = arith.constant dense<0.000000e+00> : vector<8x64xf32>
    %7 = tpu.matmul %4, %6, %cst {dimension_numbers = #tpu.dot_dimension_numbers<[1], [0], [0], [1], [0, 0, 1, 1], [], []>} : vector<8x64xbf16>, vector<64x64xbf16>, vector<8x64xf32> -> vector<8x64xf32>
    %c0_7 = arith.constant 0 : index
    %c0_8 = arith.constant 0 : index
    %8 = vector.load %arg5[%c0_7, %c0_8] : memref<1x64xf32, #tpu.memory_space<vmem>>, vector<1x64xf32>
    %9 = vector.broadcast %8 : vector<1x64xf32> to vector<8x64xf32>
    %10 = arith.addf %7, %9 : vector<8x64xf32>
    %c0_9 = arith.constant 0 : index
    %c0_10 = arith.constant 0 : index
    %11 = vector.load %arg6[%c0_9, %c0_10] : memref<64x64xbf16, #tpu.memory_space<vmem>>, vector<64x64xbf16>
    %cst_11 = arith.constant dense<0.000000e+00> : vector<8x64xf32>
    %12 = tpu.matmul %5, %11, %cst_11 {dimension_numbers = #tpu.dot_dimension_numbers<[1], [0], [0], [1], [0, 0, 1, 1], [], []>} : vector<8x64xbf16>, vector<64x64xbf16>, vector<8x64xf32> -> vector<8x64xf32>
    %c0_12 = arith.constant 0 : index
    %c0_13 = arith.constant 0 : index
    %13 = vector.load %arg7[%c0_12, %c0_13] : memref<1x64xf32, #tpu.memory_space<vmem>>, vector<1x64xf32>
    %14 = vector.broadcast %13 : vector<1x64xf32> to vector<8x64xf32>
    %15 = arith.addf %12, %14 : vector<8x64xf32>
    %c0_14 = arith.constant 0 : index
    %c0_15 = arith.constant 0 : index
    %16 = vector.load %arg8[%c0_14, %c0_15] : memref<64x64xbf16, #tpu.memory_space<vmem>>, vector<64x64xbf16>
    %cst_16 = arith.constant dense<0.000000e+00> : vector<8x64xf32>
    %17 = tpu.matmul %5, %16, %cst_16 {dimension_numbers = #tpu.dot_dimension_numbers<[1], [0], [0], [1], [0, 0, 1, 1], [], []>} : vector<8x64xbf16>, vector<64x64xbf16>, vector<8x64xf32> -> vector<8x64xf32>
    %c0_17 = arith.constant 0 : index
    %c0_18 = arith.constant 0 : index
    %18 = vector.load %arg9[%c0_17, %c0_18] : memref<1x64xf32, #tpu.memory_space<vmem>>, vector<1x64xf32>
    %19 = vector.broadcast %18 : vector<1x64xf32> to vector<8x64xf32>
    %20 = arith.addf %17, %19 : vector<8x64xf32>
    %21 = vector.shape_cast %10 : vector<8x64xf32> to vector<8x4x16xf32>
    %22 = tpu.transpose %21, [1, 0, 2] : vector<8x4x16xf32> -> vector<4x8x16xf32>
    %23 = arith.truncf %22 : vector<4x8x16xf32> to vector<4x8x16xbf16>
    %24 = vector.shape_cast %15 : vector<8x64xf32> to vector<8x4x16xf32>
    %25 = tpu.transpose %24, [1, 0, 2] : vector<8x4x16xf32> -> vector<4x8x16xf32>
    %26 = arith.truncf %25 : vector<4x8x16xf32> to vector<4x8x16xbf16>
    %27 = vector.shape_cast %20 : vector<8x64xf32> to vector<8x4x16xf32>
    %28 = tpu.transpose %27, [1, 0, 2] : vector<8x4x16xf32> -> vector<4x8x16xf32>
    %29 = arith.truncf %28 : vector<4x8x16xf32> to vector<4x8x16xbf16>
    "tpu.trace_start"() <{level = 10 : i32, message = "hqd,hkd->hqk"}> : () -> ()
    %cst_19 = arith.constant dense<0.000000e+00> : vector<4x8x8xf32>
    %30 = tpu.matmul %23, %26, %cst_19 {dimension_numbers = #tpu.dot_dimension_numbers<[2], [2], [1], [1], [0, 0, 0, 1, 1, 1], [0], [0]>} : vector<4x8x16xbf16>, vector<4x8x16xbf16>, vector<4x8x8xf32> -> vector<4x8x8xf32>
    "tpu.trace_stop"() : () -> ()
    %cst_20 = arith.constant 2.500000e-01 : f32
    %31 = vector.broadcast %cst_20 : f32 to vector<4x8x8xf32>
    %32 = arith.mulf %30, %31 : vector<4x8x8xf32>
    %cst_21 = arith.constant dense<0xFF800000> : vector<4x8xf32>
    %33 = vector.multi_reduction <maximumf>, %32, %cst_21 [2] : vector<4x8x8xf32> to vector<4x8xf32>
    %34 = vector.shape_cast %33 : vector<4x8xf32> to vector<4x8x1xf32>
    %35 = vector.broadcast %34 : vector<4x8x1xf32> to vector<4x8x8xf32>
    %36 = arith.subf %32, %35 : vector<4x8x8xf32>
    %37 = math.exp %36 : vector<4x8x8xf32>
    %cst_22 = arith.constant dense<0.000000e+00> : vector<4x8xf32>
    %38 = vector.multi_reduction <add>, %37, %cst_22 [2] : vector<4x8x8xf32> to vector<4x8xf32>
    %39 = vector.shape_cast %38 : vector<4x8xf32> to vector<4x8x1xf32>
    %40 = tpu.reciprocal %39 {approx = true} : vector<4x8x1xf32> -> vector<4x8x1xf32>
    %41 = vector.broadcast %40 : vector<4x8x1xf32> to vector<4x8x8xf32>
    %42 = arith.mulf %37, %41 : vector<4x8x8xf32>
    %43 = arith.truncf %42 : vector<4x8x8xf32> to vector<4x8x8xbf16>
    "tpu.trace_start"() <{level = 10 : i32, message = "hqk,hkd->hqd"}> : () -> ()
    %cst_23 = arith.constant dense<0.000000e+00> : vector<4x8x16xf32>
    %44 = tpu.matmul %43, %29, %cst_23 {dimension_numbers = #tpu.dot_dimension_numbers<[2], [1], [1], [2], [0, 0, 0, 1, 1, 2], [0], [0]>} : vector<4x8x8xbf16>, vector<4x8x16xbf16>, vector<4x8x16xf32> -> vector<4x8x16xf32>
    "tpu.trace_stop"() : () -> ()
    %45 = tpu.transpose %44, [1, 0, 2] : vector<4x8x16xf32> -> vector<8x4x16xf32>
    %46 = vector.shape_cast %45 : vector<8x4x16xf32> to vector<8x64xf32>
    %47 = arith.truncf %46 : vector<8x64xf32> to vector<8x64xbf16>
    %c0_24 = arith.constant 0 : index
    %c0_25 = arith.constant 0 : index
    %48 = vector.load %arg10[%c0_24, %c0_25] : memref<64x64xbf16, #tpu.memory_space<vmem>>, vector<64x64xbf16>
    %cst_26 = arith.constant dense<0.000000e+00> : vector<8x64xf32>
    %49 = tpu.matmul %47, %48, %cst_26 {dimension_numbers = #tpu.dot_dimension_numbers<[1], [0], [0], [1], [0, 0, 1, 1], [], []>} : vector<8x64xbf16>, vector<64x64xbf16>, vector<8x64xf32> -> vector<8x64xf32>
    %c0_27 = arith.constant 0 : index
    %c0_28 = arith.constant 0 : index
    %50 = vector.load %arg11[%c0_27, %c0_28] : memref<1x64xf32, #tpu.memory_space<vmem>>, vector<1x64xf32>
    %51 = vector.broadcast %50 : vector<1x64xf32> to vector<8x64xf32>
    %52 = arith.addf %49, %51 : vector<8x64xf32>
    %c0_29 = arith.constant 0 : index
    %c0_30 = arith.constant 0 : index
    %53 = vector.load %arg12[%c0_29, %c0_30] : memref<1x64xf32, #tpu.memory_space<vmem>>, vector<1x64xf32>
    %c0_31 = arith.constant 0 : index
    %c0_32 = arith.constant 0 : index
    %54 = vector.load %arg13[%c0_31, %c0_32] : memref<1x64xf32, #tpu.memory_space<vmem>>, vector<1x64xf32>
    %55 = arith.addf %1, %52 : vector<8x64xf32>
    %cst_33 = arith.constant dense<0.000000e+00> : vector<8xf32>
    %56 = vector.multi_reduction <add>, %55, %cst_33 [1] : vector<8x64xf32> to vector<8xf32>
    %57 = vector.shape_cast %56 : vector<8xf32> to vector<8x1xf32>
    %cst_34 = arith.constant 6.400000e+01 : f32
    %58 = vector.broadcast %cst_34 : f32 to vector<8x1xf32>
    %59 = arith.divf %57, %58 : vector<8x1xf32>
    %60 = vector.broadcast %59 : vector<8x1xf32> to vector<8x64xf32>
    %61 = arith.subf %55, %60 : vector<8x64xf32>
    %62 = arith.mulf %61, %61 : vector<8x64xf32>
    %cst_35 = arith.constant dense<0.000000e+00> : vector<8xf32>
    %63 = vector.multi_reduction <add>, %62, %cst_35 [1] : vector<8x64xf32> to vector<8xf32>
    %64 = vector.shape_cast %63 : vector<8xf32> to vector<8x1xf32>
    %cst_36 = arith.constant 6.400000e+01 : f32
    %65 = vector.broadcast %cst_36 : f32 to vector<8x1xf32>
    %66 = arith.divf %64, %65 : vector<8x1xf32>
    %67 = vector.broadcast %59 : vector<8x1xf32> to vector<8x64xf32>
    %68 = arith.subf %55, %67 : vector<8x64xf32>
    %cst_37 = arith.constant 9.99999974E-6 : f32
    %69 = vector.broadcast %cst_37 : f32 to vector<8x1xf32>
    %70 = arith.addf %66, %69 : vector<8x1xf32>
    %71 = math.rsqrt %70 : vector<8x1xf32>
    %72 = vector.broadcast %71 : vector<8x1xf32> to vector<8x64xf32>
    %73 = arith.mulf %68, %72 : vector<8x64xf32>
    %74 = vector.broadcast %53 : vector<1x64xf32> to vector<8x64xf32>
    %75 = arith.mulf %73, %74 : vector<8x64xf32>
    %76 = vector.broadcast %54 : vector<1x64xf32> to vector<8x64xf32>
    %77 = arith.addf %75, %76 : vector<8x64xf32>
    %c0_38 = arith.constant 0 : index
    %c0_39 = arith.constant 0 : index
    %c0_40 = arith.constant 0 : index
    %78 = vector.load %arg14[%c0_38, %c0_39, %c0_40] : memref<1x8x64xf32, #tpu.memory_space<vmem>>, vector<1x8x64xf32>
    %79 = vector.shape_cast %78 : vector<1x8x64xf32> to vector<8x64xf32>
    %80 = vector.shape_cast %77 : vector<8x64xf32> to vector<1x8x64xf32>
    tpu.vector_store %arg14[%c0_38, %c0_39, %c0_40], %80 {strides = array<i32>} : memref<1x8x64xf32, #tpu.memory_space<vmem>>, vector<1x8x64xf32>,
    return
  }
  func.func @transform_0(%arg0: i32, %arg1: i32) -> (i32, i32, i32) {
    %c0_i32 = arith.constant 0 : i32
    %c0_i32_0 = arith.constant 0 : i32
    return %arg0, %arg1, %c0_i32 : i32, i32, i32
  }
  func.func @transform_1(%arg0: i32, %arg1: i32) -> (i32, i32, i32) {
    %c0_i32 = arith.constant 0 : i32
    %c0_i32_0 = arith.constant 0 : i32
    %c0_i32_1 = arith.constant 0 : i32
    return %arg0, %c0_i32, %c0_i32_0 : i32, i32, i32
  }
  func.func @transform_2(%arg0: i32, %arg1: i32) -> (i32, i32) {
    %c0_i32 = arith.constant 0 : i32
    %c0_i32_0 = arith.constant 0 : i32
    %c0_i32_1 = arith.constant 0 : i32
    return %c0_i32, %c0_i32_0 : i32, i32
  }
  func.func @transform_3(%arg0: i32, %arg1: i32) -> (i32, i32) {
    %c0_i32 = arith.constant 0 : i32
    %c0_i32_0 = arith.constant 0 : i32
    %c0_i32_1 = arith.constant 0 : i32
    return %c0_i32, %c0_i32_0 : i32, i32
  }
  func.func @transform_4(%arg0: i32, %arg1: i32) -> (i32, i32) {
    %c0_i32 = arith.constant 0 : i32
    %c0_i32_0 = arith.constant 0 : i32
    %c0_i32_1 = arith.constant 0 : i32
    return %c0_i32, %c0_i32_0 : i32, i32
  }
  func.func @transform_5(%arg0: i32, %arg1: i32) -> (i32, i32) {
    %c0_i32 = arith.constant 0 : i32
    %c0_i32_0 = arith.constant 0 : i32
    %c0_i32_1 = arith.constant 0 : i32
    return %c0_i32, %c0_i32_0 : i32, i32
  }
  func.func @transform_6(%arg0: i32, %arg1: i32) -> (i32, i32) {
    %c0_i32 = arith.constant 0 : i32
    %c0_i32_0 = arith.constant 0 : i32
    %c0_i32_1 = arith.constant 0 : i32
    return %c0_i32, %c0_i32_0 : i32, i32
  }
  func.func @transform_7(%arg0: i32, %arg1: i32) -> (i32, i32) {
    %c0_i32 = arith.constant 0 : i32
    %c0_i32_0 = arith.constant 0 : i32
    %c0_i32_1 = arith.constant 0 : i32
    return %c0_i32, %c0_i32_0 : i32, i32
  }
  func.func @transform_8(%arg0: i32, %arg1: i32) -> (i32, i32) {
    %c0_i32 = arith.constant 0 : i32
    %c0_i32_0 = arith.constant 0 : i32
    %c0_i32_1 = arith.constant 0 : i32
    return %c0_i32, %c0_i32_0 : i32, i32
  }
  func.func @transform_9(%arg0: i32, %arg1: i32) -> (i32, i32) {
    %c0_i32 = arith.constant 0 : i32
    %c0_i32_0 = arith.constant 0 : i32
    %c0_i32_1 = arith.constant 0 : i32
    return %c0_i32, %c0_i32_0 : i32, i32
  }
  func.func @transform_10(%arg0: i32, %arg1: i32) -> (i32, i32) {
    %c0_i32 = arith.constant 0 : i32
    %c0_i32_0 = arith.constant 0 : i32
    %c0_i32_1 = arith.constant 0 : i32
    return %c0_i32, %c0_i32_0 : i32, i32
  }
  func.func @transform_11(%arg0: i32, %arg1: i32) -> (i32, i32) {
    %c0_i32 = arith.constant 0 : i32
    %c0_i32_0 = arith.constant 0 : i32
    %c0_i32_1 = arith.constant 0 : i32
    return %c0_i32, %c0_i32_0 : i32, i32
  }
  func.func @transform_12(%arg0: i32, %arg1: i32) -> (i32, i32, i32) {
    %c0_i32 = arith.constant 0 : i32
    %c0_i32_0 = arith.constant 0 : i32
    return %arg0, %arg1, %c0_i32 : i32, i32, i32
  }
}

module attributes {stable_mosaic.version = 11 : i64} {
  func.func @_attn_block_kernel(%arg0: i32, %arg1: i32, %arg2: memref<1x8x64xf32, #tpu.memory_space<vmem>>, %arg3: memref<1x8x64xf32, #tpu.memory_space<vmem>>, %arg4: memref<64x64xbf16, #tpu.memory_space<vmem>>, %arg5: memref<1x64xf32, #tpu.memory_space<vmem>>, %arg6: memref<64x64xbf16, #tpu.memory_space<vmem>>, %arg7: memref<1x64xf32, #tpu.memory_space<vmem>>, %arg8: memref<64x64xbf16, #tpu.memory_space<vmem>>, %arg9: memref<1x64xf32, #tpu.memory_space<vmem>>, %arg10: memref<64x64xbf16, #tpu.memory_space<vmem>>, %arg11: memref<1x64xf32, #tpu.memory_space<vmem>>, %arg12: memref<1x64xf32, #tpu.memory_space<vmem>>, %arg13: memref<1x64xf32, #tpu.memory_space<vmem>>, %arg14: memref<1x8x64xf32, #tpu.memory_space<vmem>>) attributes {dimension_semantics = [#tpu.dimension_semantics<parallel>, #tpu.dimension_semantics<parallel>], iteration_bounds = array<i64: 2, 1>, scalar_prefetch = 0 : i64, scratch_operands = 0 : i64, tpu.core_type = #tpu.core_type<tc>, window_params = [{transform_indices = @transform_0, window_bounds = array<i64: 1, 8, 64>}, {transform_indices = @transform_1, window_bounds = array<i64: 1, 8, 64>}, {pipeline_mode = #tpu.pipeline_mode<synchronous>, transform_indices = @transform_2, window_bounds = array<i64: 64, 64>}, {pipeline_mode = #tpu.pipeline_mode<synchronous>, transform_indices = @transform_3, window_bounds = array<i64: 1, 64>}, {pipeline_mode = #tpu.pipeline_mode<synchronous>, transform_indices = @transform_4, window_bounds = array<i64: 64, 64>}, {pipeline_mode = #tpu.pipeline_mode<synchronous>, transform_indices = @transform_5, window_bounds = array<i64: 1, 64>}, {pipeline_mode = #tpu.pipeline_mode<synchronous>, transform_indices = @transform_6, window_bounds = array<i64: 64, 64>}, {pipeline_mode = #tpu.pipeline_mode<synchronous>, transform_indices = @transform_7, window_bounds = array<i64: 1, 64>}, {pipeline_mode = #tpu.pipeline_mode<synchronous>, transform_indices = @transform_8, window_bounds = array<i64: 64, 64>}, {pipeline_mode = #tpu.pipeline_mode<synchronous>, transform_indices = @transform_9, window_bounds = array<i64: 1, 64>}, {pipeline_mode = #tpu.pipeline_mode<synchronous>, transform_indices = @transform_10, window_bounds = array<i64: 1, 64>}, {pipeline_mode = #tpu.pipeline_mode<synchronous>, transform_indices = @transform_11, window_bounds = array<i64: 1, 64>}, {transform_indices = @transform_12, window_bounds = array<i64: 1, 8, 64>}]} {
    %c0 = arith.constant 0 : index
    %c0_0 = arith.constant 0 : index
    %c0_1 = arith.constant 0 : index
    %0 = vector.load %arg2[%c0, %c0_0, %c0_1] : memref<1x8x64xf32, #tpu.memory_space<vmem>>, vector<1x8x64xf32>
    %1 = vector.shape_cast %0 : vector<1x8x64xf32> to vector<8x64xf32>
    %c0_2 = arith.constant 0 : index
    %c0_3 = arith.constant 0 : index
    %c0_4 = arith.constant 0 : index
    %2 = vector.load %arg3[%c0_2, %c0_3, %c0_4] : memref<1x8x64xf32, #tpu.memory_space<vmem>>, vector<1x8x64xf32>
    %3 = vector.shape_cast %2 : vector<1x8x64xf32> to vector<8x64xf32>
    %4 = arith.truncf %1 : vector<8x64xf32> to vector<8x64xbf16>
    %5 = arith.truncf %3 : vector<8x64xf32> to vector<8x64xbf16>
    %c0_5 = arith.constant 0 : index
    %c0_6 = arith.constant 0 : index
    %6 = vector.load %arg4[%c0_5, %c0_6] : memref<64x64xbf16, #tpu.memory_space<vmem>>, vector<64x64xbf16>
    %cst = arith.constant dense<0.000000e+00> : vector<8x64xf32>
    %7 = tpu.matmul %4, %6, %cst {dimension_numbers = #tpu.dot_dimension_numbers<[1], [0], [0], [1], [0, 0, 1, 1], [], []>} : vector<8x64xbf16>, vector<64x64xbf16>, vector<8x64xf32> -> vector<8x64xf32>
    %c0_7 = arith.constant 0 : index
    %c0_8 = arith.constant 0 : index
    %8 = vector.load %arg5[%c0_7, %c0_8] : memref<1x64xf32, #tpu.memory_space<vmem>>, vector<1x64xf32>
    %9 = vector.broadcast %8 : vector<1x64xf32> to vector<8x64xf32>
    %10 = arith.addf %7, %9 : vector<8x64xf32>
    %c0_9 = arith.constant 0 : index
    %c0_10 = arith.constant 0 : index
    %11 = vector.load %arg6[%c0_9, %c0_10] : memref<64x64xbf16, #tpu.memory_space<vmem>>, vector<64x64xbf16>
    %cst_11 = arith.constant dense<0.000000e+00> : vector<8x64xf32>
    %12 = tpu.matmul %5, %11, %cst_11 {dimension_numbers = #tpu.dot_dimension_numbers<[1], [0], [0], [1], [0, 0, 1, 1], [], []>} : vector<8x64xbf16>, vector<64x64xbf16>, vector<8x64xf32> -> vector<8x64xf32>
    %c0_12 = arith.constant 0 : index
    %c0_13 = arith.constant 0 : index
    %13 = vector.load %arg7[%c0_12, %c0_13] : memref<1x64xf32, #tpu.memory_space<vmem>>, vector<1x64xf32>
    %14 = vector.broadcast %13 : vector<1x64xf32> to vector<8x64xf32>
    %15 = arith.addf %12, %14 : vector<8x64xf32>
    %c0_14 = arith.constant 0 : index
    %c0_15 = arith.constant 0 : index
    %16 = vector.load %arg8[%c0_14, %c0_15] : memref<64x64xbf16, #tpu.memory_space<vmem>>, vector<64x64xbf16>
    %cst_16 = arith.constant dense<0.000000e+00> : vector<8x64xf32>
    %17 = tpu.matmul %5, %16, %cst_16 {dimension_numbers = #tpu.dot_dimension_numbers<[1], [0], [0], [1], [0, 0, 1, 1], [], []>} : vector<8x64xbf16>, vector<64x64xbf16>, vector<8x64xf32> -> vector<8x64xf32>
    %c0_17 = arith.constant 0 : index
    %c0_18 = arith.constant 0 : index
    %18 = vector.load %arg9[%c0_17, %c0_18] : memref<1x64xf32, #tpu.memory_space<vmem>>, vector<1x64xf32>
    %19 = vector.broadcast %18 : vector<1x64xf32> to vector<8x64xf32>
    %20 = arith.addf %17, %19 : vector<8x64xf32>
    %21 = vector.shape_cast %10 : vector<8x64xf32> to vector<8x4x16xf32>
    %22 = tpu.transpose %21, [1, 0, 2] : vector<8x4x16xf32> -> vector<4x8x16xf32>
    %23 = arith.truncf %22 : vector<4x8x16xf32> to vector<4x8x16xbf16>
    %24 = vector.shape_cast %15 : vector<8x64xf32> to vector<8x4x16xf32>
    %25 = tpu.transpose %24, [1, 0, 2] : vector<8x4x16xf32> -> vector<4x8x16xf32>
    %26 = arith.truncf %25 : vector<4x8x16xf32> to vector<4x8x16xbf16>
    %27 = vector.shape_cast %20 : vector<8x64xf32> to vector<8x4x16xf32>
    %28 = tpu.transpose %27, [1, 0, 2] : vector<8x4x16xf32> -> vector<4x8x16xf32>
    %29 = arith.truncf %28 : vector<4x8x16xf32> to vector<4x8x16xbf16>
    "tpu.trace_start"() <{level = 10 : i32, message = "hqd,hkd->hqk"}> : () -> ()
    %cst_19 = arith.constant dense<0.000000e+00> : vector<4x8x8xf32>
    %30 = tpu.matmul %23, %26, %cst_19 {dimension_numbers = #tpu.dot_dimension_numbers<[2], [2], [1], [1], [0, 0, 0, 1, 1, 1], [0], [0]>} : vector<4x8x16xbf16>, vector<4x8x16xbf16>, vector<4x8x8xf32> -> vector<4x8x8xf32>
    "tpu.trace_stop"() : () -> ()
    %cst_20 = arith.constant 2.500000e-01 : f32
    %31 = vector.broadcast %cst_20 : f32 to vector<4x8x8xf32>
    %32 = arith.mulf %30, %31 : vector<4x8x8xf32>
    %c8_i32 = arith.constant 8 : i32
    %33 = arith.muli %arg1, %c8_i32 : i32
    %34 = tpu.iota {dimensions = array<i32: 0>} : vector<8x8xi32>
    %35 = vector.broadcast %33 : i32 to vector<8x8xi32>
    %36 = arith.addi %34, %35 : vector<8x8xi32>
    %37 = tpu.iota {dimensions = array<i32: 1>} : vector<8x8xi32>
    %38 = arith.cmpi sle, %37, %36 : vector<8x8xi32>
    %cst_21 = arith.constant 0.000000e+00 : f32
    %cst_22 = arith.constant -1.000000e+09 : f32
    %39 = vector.broadcast %cst_21 : f32 to vector<8x8xf32>
    %40 = vector.broadcast %cst_22 : f32 to vector<8x8xf32>
    %41 = arith.select %38, %39, %40 : vector<8x8xi1>, vector<8x8xf32>
    %42 = vector.shape_cast %41 : vector<8x8xf32> to vector<1x8x8xf32>
    %43 = vector.broadcast %42 : vector<1x8x8xf32> to vector<4x8x8xf32>
    %44 = arith.addf %32, %43 : vector<4x8x8xf32>
    %cst_23 = arith.constant dense<0xFF800000> : vector<4x8xf32>
    %45 = vector.multi_reduction <maximumf>, %44, %cst_23 [2] : vector<4x8x8xf32> to vector<4x8xf32>
    %46 = vector.shape_cast %45 : vector<4x8xf32> to vector<4x8x1xf32>
    %47 = vector.broadcast %46 : vector<4x8x1xf32> to vector<4x8x8xf32>
    %48 = arith.subf %44, %47 : vector<4x8x8xf32>
    %49 = math.exp %48 : vector<4x8x8xf32>
    %cst_24 = arith.constant dense<0.000000e+00> : vector<4x8xf32>
    %50 = vector.multi_reduction <add>, %49, %cst_24 [2] : vector<4x8x8xf32> to vector<4x8xf32>
    %51 = vector.shape_cast %50 : vector<4x8xf32> to vector<4x8x1xf32>
    %52 = tpu.reciprocal %51 {approx = true} : vector<4x8x1xf32> -> vector<4x8x1xf32>
    %53 = vector.broadcast %52 : vector<4x8x1xf32> to vector<4x8x8xf32>
    %54 = arith.mulf %49, %53 : vector<4x8x8xf32>
    %55 = arith.truncf %54 : vector<4x8x8xf32> to vector<4x8x8xbf16>
    "tpu.trace_start"() <{level = 10 : i32, message = "hqk,hkd->hqd"}> : () -> ()
    %cst_25 = arith.constant dense<0.000000e+00> : vector<4x8x16xf32>
    %56 = tpu.matmul %55, %29, %cst_25 {dimension_numbers = #tpu.dot_dimension_numbers<[2], [1], [1], [2], [0, 0, 0, 1, 1, 2], [0], [0]>} : vector<4x8x8xbf16>, vector<4x8x16xbf16>, vector<4x8x16xf32> -> vector<4x8x16xf32>
    "tpu.trace_stop"() : () -> ()
    %57 = tpu.transpose %56, [1, 0, 2] : vector<4x8x16xf32> -> vector<8x4x16xf32>
    %58 = vector.shape_cast %57 : vector<8x4x16xf32> to vector<8x64xf32>
    %59 = arith.truncf %58 : vector<8x64xf32> to vector<8x64xbf16>
    %c0_26 = arith.constant 0 : index
    %c0_27 = arith.constant 0 : index
    %60 = vector.load %arg10[%c0_26, %c0_27] : memref<64x64xbf16, #tpu.memory_space<vmem>>, vector<64x64xbf16>
    %cst_28 = arith.constant dense<0.000000e+00> : vector<8x64xf32>
    %61 = tpu.matmul %59, %60, %cst_28 {dimension_numbers = #tpu.dot_dimension_numbers<[1], [0], [0], [1], [0, 0, 1, 1], [], []>} : vector<8x64xbf16>, vector<64x64xbf16>, vector<8x64xf32> -> vector<8x64xf32>
    %c0_29 = arith.constant 0 : index
    %c0_30 = arith.constant 0 : index
    %62 = vector.load %arg11[%c0_29, %c0_30] : memref<1x64xf32, #tpu.memory_space<vmem>>, vector<1x64xf32>
    %63 = vector.broadcast %62 : vector<1x64xf32> to vector<8x64xf32>
    %64 = arith.addf %61, %63 : vector<8x64xf32>
    %c0_31 = arith.constant 0 : index
    %c0_32 = arith.constant 0 : index
    %65 = vector.load %arg12[%c0_31, %c0_32] : memref<1x64xf32, #tpu.memory_space<vmem>>, vector<1x64xf32>
    %c0_33 = arith.constant 0 : index
    %c0_34 = arith.constant 0 : index
    %66 = vector.load %arg13[%c0_33, %c0_34] : memref<1x64xf32, #tpu.memory_space<vmem>>, vector<1x64xf32>
    %67 = arith.addf %1, %64 : vector<8x64xf32>
    %cst_35 = arith.constant dense<0.000000e+00> : vector<8xf32>
    %68 = vector.multi_reduction <add>, %67, %cst_35 [1] : vector<8x64xf32> to vector<8xf32>
    %69 = vector.shape_cast %68 : vector<8xf32> to vector<8x1xf32>
    %cst_36 = arith.constant 6.400000e+01 : f32
    %70 = vector.broadcast %cst_36 : f32 to vector<8x1xf32>
    %71 = arith.divf %69, %70 : vector<8x1xf32>
    %72 = vector.broadcast %71 : vector<8x1xf32> to vector<8x64xf32>
    %73 = arith.subf %67, %72 : vector<8x64xf32>
    %74 = arith.mulf %73, %73 : vector<8x64xf32>
    %cst_37 = arith.constant dense<0.000000e+00> : vector<8xf32>
    %75 = vector.multi_reduction <add>, %74, %cst_37 [1] : vector<8x64xf32> to vector<8xf32>
    %76 = vector.shape_cast %75 : vector<8xf32> to vector<8x1xf32>
    %cst_38 = arith.constant 6.400000e+01 : f32
    %77 = vector.broadcast %cst_38 : f32 to vector<8x1xf32>
    %78 = arith.divf %76, %77 : vector<8x1xf32>
    %79 = vector.broadcast %71 : vector<8x1xf32> to vector<8x64xf32>
    %80 = arith.subf %67, %79 : vector<8x64xf32>
    %cst_39 = arith.constant 9.99999974E-6 : f32
    %81 = vector.broadcast %cst_39 : f32 to vector<8x1xf32>
    %82 = arith.addf %78, %81 : vector<8x1xf32>
    %83 = math.rsqrt %82 : vector<8x1xf32>
    %84 = vector.broadcast %83 : vector<8x1xf32> to vector<8x64xf32>
    %85 = arith.mulf %80, %84 : vector<8x64xf32>
    %86 = vector.broadcast %65 : vector<1x64xf32> to vector<8x64xf32>
    %87 = arith.mulf %85, %86 : vector<8x64xf32>
    %88 = vector.broadcast %66 : vector<1x64xf32> to vector<8x64xf32>
    %89 = arith.addf %87, %88 : vector<8x64xf32>
    %c0_40 = arith.constant 0 : index
    %c0_41 = arith.constant 0 : index
    %c0_42 = arith.constant 0 : index
    %90 = vector.load %arg14[%c0_40, %c0_41, %c0_42] : memref<1x8x64xf32, #tpu.memory_space<vmem>>, vector<1x8x64xf32>
    %91 = vector.shape_cast %90 : vector<1x8x64xf32> to vector<8x64xf32>
    %92 = vector.shape_cast %89 : vector<8x64xf32> to vector<1x8x64xf32>
    tpu.vector_store %arg14[%c0_40, %c0_41, %c0_42], %92 {strides = array<i32>} : memref<1x8x64xf32, #tpu.memory_space<vmem>>, vector<1x8x64xf32>,
    return
  }
  func.func @transform_0(%arg0: i32, %arg1: i32) -> (i32, i32, i32) {
    %c0_i32 = arith.constant 0 : i32
    %c0_i32_0 = arith.constant 0 : i32
    return %arg0, %arg1, %c0_i32 : i32, i32, i32
  }
  func.func @transform_1(%arg0: i32, %arg1: i32) -> (i32, i32, i32) {
    %c0_i32 = arith.constant 0 : i32
    %c0_i32_0 = arith.constant 0 : i32
    %c0_i32_1 = arith.constant 0 : i32
    return %arg0, %c0_i32, %c0_i32_0 : i32, i32, i32
  }
  func.func @transform_2(%arg0: i32, %arg1: i32) -> (i32, i32) {
    %c0_i32 = arith.constant 0 : i32
    %c0_i32_0 = arith.constant 0 : i32
    %c0_i32_1 = arith.constant 0 : i32
    return %c0_i32, %c0_i32_0 : i32, i32
  }
  func.func @transform_3(%arg0: i32, %arg1: i32) -> (i32, i32) {
    %c0_i32 = arith.constant 0 : i32
    %c0_i32_0 = arith.constant 0 : i32
    %c0_i32_1 = arith.constant 0 : i32
    return %c0_i32, %c0_i32_0 : i32, i32
  }
  func.func @transform_4(%arg0: i32, %arg1: i32) -> (i32, i32) {
    %c0_i32 = arith.constant 0 : i32
    %c0_i32_0 = arith.constant 0 : i32
    %c0_i32_1 = arith.constant 0 : i32
    return %c0_i32, %c0_i32_0 : i32, i32
  }
  func.func @transform_5(%arg0: i32, %arg1: i32) -> (i32, i32) {
    %c0_i32 = arith.constant 0 : i32
    %c0_i32_0 = arith.constant 0 : i32
    %c0_i32_1 = arith.constant 0 : i32
    return %c0_i32, %c0_i32_0 : i32, i32
  }
  func.func @transform_6(%arg0: i32, %arg1: i32) -> (i32, i32) {
    %c0_i32 = arith.constant 0 : i32
    %c0_i32_0 = arith.constant 0 : i32
    %c0_i32_1 = arith.constant 0 : i32
    return %c0_i32, %c0_i32_0 : i32, i32
  }
  func.func @transform_7(%arg0: i32, %arg1: i32) -> (i32, i32) {
    %c0_i32 = arith.constant 0 : i32
    %c0_i32_0 = arith.constant 0 : i32
    %c0_i32_1 = arith.constant 0 : i32
    return %c0_i32, %c0_i32_0 : i32, i32
  }
  func.func @transform_8(%arg0: i32, %arg1: i32) -> (i32, i32) {
    %c0_i32 = arith.constant 0 : i32
    %c0_i32_0 = arith.constant 0 : i32
    %c0_i32_1 = arith.constant 0 : i32
    return %c0_i32, %c0_i32_0 : i32, i32
  }
  func.func @transform_9(%arg0: i32, %arg1: i32) -> (i32, i32) {
    %c0_i32 = arith.constant 0 : i32
    %c0_i32_0 = arith.constant 0 : i32
    %c0_i32_1 = arith.constant 0 : i32
    return %c0_i32, %c0_i32_0 : i32, i32
  }
  func.func @transform_10(%arg0: i32, %arg1: i32) -> (i32, i32) {
    %c0_i32 = arith.constant 0 : i32
    %c0_i32_0 = arith.constant 0 : i32
    %c0_i32_1 = arith.constant 0 : i32
    return %c0_i32, %c0_i32_0 : i32, i32
  }
  func.func @transform_11(%arg0: i32, %arg1: i32) -> (i32, i32) {
    %c0_i32 = arith.constant 0 : i32
    %c0_i32_0 = arith.constant 0 : i32
    %c0_i32_1 = arith.constant 0 : i32
    return %c0_i32, %c0_i32_0 : i32, i32
  }
  func.func @transform_12(%arg0: i32, %arg1: i32) -> (i32, i32, i32) {
    %c0_i32 = arith.constant 0 : i32
    %c0_i32_0 = arith.constant 0 : i32
    return %arg0, %arg1, %c0_i32 : i32, i32, i32
  }
}

module attributes {stable_mosaic.version = 11 : i64} {
  func.func @_out_head_kernel(%arg0: i32, %arg1: i32, %arg2: memref<1x8x64xf32, #tpu.memory_space<vmem>>, %arg3: memref<64x128xbf16, #tpu.memory_space<vmem>>, %arg4: memref<1x128xf32, #tpu.memory_space<vmem>>, %arg5: memref<1x8x128xf32, #tpu.memory_space<vmem>>) attributes {dimension_semantics = [#tpu.dimension_semantics<parallel>, #tpu.dimension_semantics<parallel>], iteration_bounds = array<i64: 2, 1>, scalar_prefetch = 0 : i64, scratch_operands = 0 : i64, tpu.core_type = #tpu.core_type<tc>, window_params = [{transform_indices = @transform_0, window_bounds = array<i64: 1, 8, 64>}, {transform_indices = @transform_1, window_bounds = array<i64: 64, 128>}, {transform_indices = @transform_2, window_bounds = array<i64: 1, 128>}, {transform_indices = @transform_3, window_bounds = array<i64: 1, 8, 128>}]} {
    %c0 = arith.constant 0 : index
    %c0_0 = arith.constant 0 : index
    %c0_1 = arith.constant 0 : index
    %0 = vector.load %arg2[%c0, %c0_0, %c0_1] : memref<1x8x64xf32, #tpu.memory_space<vmem>>, vector<1x8x64xf32>
    %1 = vector.shape_cast %0 : vector<1x8x64xf32> to vector<8x64xf32>
    %2 = arith.truncf %1 : vector<8x64xf32> to vector<8x64xbf16>
    %c0_2 = arith.constant 0 : index
    %c0_3 = arith.constant 0 : index
    %3 = vector.load %arg3[%c0_2, %c0_3] : memref<64x128xbf16, #tpu.memory_space<vmem>>, vector<64x128xbf16>
    %cst = arith.constant dense<0.000000e+00> : vector<8x128xf32>
    %4 = tpu.matmul %2, %3, %cst {dimension_numbers = #tpu.dot_dimension_numbers<[1], [0], [0], [1], [0, 0, 1, 1], [], []>} : vector<8x64xbf16>, vector<64x128xbf16>, vector<8x128xf32> -> vector<8x128xf32>
    %c0_4 = arith.constant 0 : index
    %c0_5 = arith.constant 0 : index
    %5 = vector.load %arg4[%c0_4, %c0_5] : memref<1x128xf32, #tpu.memory_space<vmem>>, vector<1x128xf32>
    %6 = vector.broadcast %5 : vector<1x128xf32> to vector<8x128xf32>
    %7 = arith.addf %4, %6 : vector<8x128xf32>
    %cst_6 = arith.constant dense<0xFF800000> : vector<128xf32>
    %8 = vector.multi_reduction <maximumf>, %7, %cst_6 [0] : vector<8x128xf32> to vector<128xf32>
    %9 = vector.shape_cast %8 : vector<128xf32> to vector<1x128xf32>
    %10 = vector.broadcast %9 : vector<1x128xf32> to vector<8x128xf32>
    %11 = arith.subf %7, %10 : vector<8x128xf32>
    %12 = math.exp %11 : vector<8x128xf32>
    %cst_7 = arith.constant dense<0.000000e+00> : vector<128xf32>
    %13 = vector.multi_reduction <add>, %12, %cst_7 [0] : vector<8x128xf32> to vector<128xf32>
    %14 = vector.shape_cast %13 : vector<128xf32> to vector<1x128xf32>
    %15 = vector.broadcast %14 : vector<1x128xf32> to vector<8x128xf32>
    %16 = arith.divf %12, %15 : vector<8x128xf32>
    %c0_8 = arith.constant 0 : index
    %c0_9 = arith.constant 0 : index
    %c0_10 = arith.constant 0 : index
    %17 = vector.load %arg5[%c0_8, %c0_9, %c0_10] : memref<1x8x128xf32, #tpu.memory_space<vmem>>, vector<1x8x128xf32>
    %18 = vector.shape_cast %17 : vector<1x8x128xf32> to vector<8x128xf32>
    %19 = vector.shape_cast %16 : vector<8x128xf32> to vector<1x8x128xf32>
    tpu.vector_store %arg5[%c0_8, %c0_9, %c0_10], %19 {strides = array<i32>} : memref<1x8x128xf32, #tpu.memory_space<vmem>>, vector<1x8x128xf32>,
    return
  }
  func.func @transform_0(%arg0: i32, %arg1: i32) -> (i32, i32, i32) {
    %c0_i32 = arith.constant 0 : i32
    %c0_i32_0 = arith.constant 0 : i32
    %c0_i32_1 = arith.constant 0 : i32
    return %arg0, %c0_i32, %c0_i32_0 : i32, i32, i32
  }
  func.func @transform_1(%arg0: i32, %arg1: i32) -> (i32, i32) {
    %c0_i32 = arith.constant 0 : i32
    %c0_i32_0 = arith.constant 0 : i32
    return %c0_i32, %arg1 : i32, i32
  }
  func.func @transform_2(%arg0: i32, %arg1: i32) -> (i32, i32) {
    %c0_i32 = arith.constant 0 : i32
    %c0_i32_0 = arith.constant 0 : i32
    return %c0_i32, %arg1 : i32, i32
  }
  func.func @transform_3(%arg0: i32, %arg1: i32) -> (i32, i32, i32) {
    %c0_i32 = arith.constant 0 : i32
    %c0_i32_0 = arith.constant 0 : i32
    return %arg0, %c0_i32, %arg1 : i32, i32, i32
  }
}

module attributes {stable_mosaic.version = 11 : i64} {
  func.func @_ffn_block_kernel(%arg0: i32, %arg1: i32, %arg2: memref<1x8x64xf32, #tpu.memory_space<vmem>>, %arg3: memref<64x128xbf16, #tpu.memory_space<vmem>>, %arg4: memref<1x128xf32, #tpu.memory_space<vmem>>, %arg5: memref<128x64xbf16, #tpu.memory_space<vmem>>, %arg6: memref<1x64xf32, #tpu.memory_space<vmem>>, %arg7: memref<1x64xf32, #tpu.memory_space<vmem>>, %arg8: memref<1x64xf32, #tpu.memory_space<vmem>>, %arg9: memref<1x8x64xf32, #tpu.memory_space<vmem>>) attributes {dimension_semantics = [#tpu.dimension_semantics<parallel>, #tpu.dimension_semantics<parallel>], iteration_bounds = array<i64: 2, 1>, scalar_prefetch = 0 : i64, scratch_operands = 0 : i64, tpu.core_type = #tpu.core_type<tc>, window_params = [{transform_indices = @transform_0, window_bounds = array<i64: 1, 8, 64>}, {pipeline_mode = #tpu.pipeline_mode<synchronous>, transform_indices = @transform_1, window_bounds = array<i64: 64, 128>}, {pipeline_mode = #tpu.pipeline_mode<synchronous>, transform_indices = @transform_2, window_bounds = array<i64: 1, 128>}, {pipeline_mode = #tpu.pipeline_mode<synchronous>, transform_indices = @transform_3, window_bounds = array<i64: 128, 64>}, {pipeline_mode = #tpu.pipeline_mode<synchronous>, transform_indices = @transform_4, window_bounds = array<i64: 1, 64>}, {pipeline_mode = #tpu.pipeline_mode<synchronous>, transform_indices = @transform_5, window_bounds = array<i64: 1, 64>}, {pipeline_mode = #tpu.pipeline_mode<synchronous>, transform_indices = @transform_6, window_bounds = array<i64: 1, 64>}, {transform_indices = @transform_7, window_bounds = array<i64: 1, 8, 64>}]} {
    %c0 = arith.constant 0 : index
    %c0_0 = arith.constant 0 : index
    %c0_1 = arith.constant 0 : index
    %0 = vector.load %arg2[%c0, %c0_0, %c0_1] : memref<1x8x64xf32, #tpu.memory_space<vmem>>, vector<1x8x64xf32>
    %1 = vector.shape_cast %0 : vector<1x8x64xf32> to vector<8x64xf32>
    %2 = arith.truncf %1 : vector<8x64xf32> to vector<8x64xbf16>
    %c0_2 = arith.constant 0 : index
    %c0_3 = arith.constant 0 : index
    %3 = vector.load %arg3[%c0_2, %c0_3] : memref<64x128xbf16, #tpu.memory_space<vmem>>, vector<64x128xbf16>
    %cst = arith.constant dense<0.000000e+00> : vector<8x128xf32>
    %4 = tpu.matmul %2, %3, %cst {dimension_numbers = #tpu.dot_dimension_numbers<[1], [0], [0], [1], [0, 0, 1, 1], [], []>} : vector<8x64xbf16>, vector<64x128xbf16>, vector<8x128xf32> -> vector<8x128xf32>
    %c0_4 = arith.constant 0 : index
    %c0_5 = arith.constant 0 : index
    %5 = vector.load %arg4[%c0_4, %c0_5] : memref<1x128xf32, #tpu.memory_space<vmem>>, vector<1x128xf32>
    %6 = vector.broadcast %5 : vector<1x128xf32> to vector<8x128xf32>
    %7 = arith.addf %4, %6 : vector<8x128xf32>
    %cst_6 = arith.constant 0.000000e+00 : f32
    %8 = vector.broadcast %cst_6 : f32 to vector<8x128xf32>
    %9 = arith.maximumf %7, %8 : vector<8x128xf32>
    %10 = arith.truncf %9 : vector<8x128xf32> to vector<8x128xbf16>
    %c0_7 = arith.constant 0 : index
    %c0_8 = arith.constant 0 : index
    %11 = vector.load %arg5[%c0_7, %c0_8] : memref<128x64xbf16, #tpu.memory_space<vmem>>, vector<128x64xbf16>
    %cst_9 = arith.constant dense<0.000000e+00> : vector<8x64xf32>
    %12 = tpu.matmul %10, %11, %cst_9 {dimension_numbers = #tpu.dot_dimension_numbers<[1], [0], [0], [1], [0, 0, 1, 1], [], []>} : vector<8x128xbf16>, vector<128x64xbf16>, vector<8x64xf32> -> vector<8x64xf32>
    %c0_10 = arith.constant 0 : index
    %c0_11 = arith.constant 0 : index
    %13 = vector.load %arg6[%c0_10, %c0_11] : memref<1x64xf32, #tpu.memory_space<vmem>>, vector<1x64xf32>
    %14 = vector.broadcast %13 : vector<1x64xf32> to vector<8x64xf32>
    %15 = arith.addf %12, %14 : vector<8x64xf32>
    %c0_12 = arith.constant 0 : index
    %c0_13 = arith.constant 0 : index
    %16 = vector.load %arg7[%c0_12, %c0_13] : memref<1x64xf32, #tpu.memory_space<vmem>>, vector<1x64xf32>
    %c0_14 = arith.constant 0 : index
    %c0_15 = arith.constant 0 : index
    %17 = vector.load %arg8[%c0_14, %c0_15] : memref<1x64xf32, #tpu.memory_space<vmem>>, vector<1x64xf32>
    %18 = arith.addf %1, %15 : vector<8x64xf32>
    %cst_16 = arith.constant dense<0.000000e+00> : vector<8xf32>
    %19 = vector.multi_reduction <add>, %18, %cst_16 [1] : vector<8x64xf32> to vector<8xf32>
    %20 = vector.shape_cast %19 : vector<8xf32> to vector<8x1xf32>
    %cst_17 = arith.constant 6.400000e+01 : f32
    %21 = vector.broadcast %cst_17 : f32 to vector<8x1xf32>
    %22 = arith.divf %20, %21 : vector<8x1xf32>
    %23 = vector.broadcast %22 : vector<8x1xf32> to vector<8x64xf32>
    %24 = arith.subf %18, %23 : vector<8x64xf32>
    %25 = arith.mulf %24, %24 : vector<8x64xf32>
    %cst_18 = arith.constant dense<0.000000e+00> : vector<8xf32>
    %26 = vector.multi_reduction <add>, %25, %cst_18 [1] : vector<8x64xf32> to vector<8xf32>
    %27 = vector.shape_cast %26 : vector<8xf32> to vector<8x1xf32>
    %cst_19 = arith.constant 6.400000e+01 : f32
    %28 = vector.broadcast %cst_19 : f32 to vector<8x1xf32>
    %29 = arith.divf %27, %28 : vector<8x1xf32>
    %30 = vector.broadcast %22 : vector<8x1xf32> to vector<8x64xf32>
    %31 = arith.subf %18, %30 : vector<8x64xf32>
    %cst_20 = arith.constant 9.99999974E-6 : f32
    %32 = vector.broadcast %cst_20 : f32 to vector<8x1xf32>
    %33 = arith.addf %29, %32 : vector<8x1xf32>
    %34 = math.rsqrt %33 : vector<8x1xf32>
    %35 = vector.broadcast %34 : vector<8x1xf32> to vector<8x64xf32>
    %36 = arith.mulf %31, %35 : vector<8x64xf32>
    %37 = vector.broadcast %16 : vector<1x64xf32> to vector<8x64xf32>
    %38 = arith.mulf %36, %37 : vector<8x64xf32>
    %39 = vector.broadcast %17 : vector<1x64xf32> to vector<8x64xf32>
    %40 = arith.addf %38, %39 : vector<8x64xf32>
    %c0_21 = arith.constant 0 : index
    %c0_22 = arith.constant 0 : index
    %c0_23 = arith.constant 0 : index
    %41 = vector.load %arg9[%c0_21, %c0_22, %c0_23] : memref<1x8x64xf32, #tpu.memory_space<vmem>>, vector<1x8x64xf32>
    %42 = vector.shape_cast %41 : vector<1x8x64xf32> to vector<8x64xf32>
    %43 = vector.shape_cast %40 : vector<8x64xf32> to vector<1x8x64xf32>
    tpu.vector_store %arg9[%c0_21, %c0_22, %c0_23], %43 {strides = array<i32>} : memref<1x8x64xf32, #tpu.memory_space<vmem>>, vector<1x8x64xf32>,
    return
  }
  func.func @transform_0(%arg0: i32, %arg1: i32) -> (i32, i32, i32) {
    %c0_i32 = arith.constant 0 : i32
    %c0_i32_0 = arith.constant 0 : i32
    return %arg0, %arg1, %c0_i32 : i32, i32, i32
  }
  func.func @transform_1(%arg0: i32, %arg1: i32) -> (i32, i32) {
    %c0_i32 = arith.constant 0 : i32
    %c0_i32_0 = arith.constant 0 : i32
    %c0_i32_1 = arith.constant 0 : i32
    return %c0_i32, %c0_i32_0 : i32, i32
  }
  func.func @transform_2(%arg0: i32, %arg1: i32) -> (i32, i32) {
    %c0_i32 = arith.constant 0 : i32
    %c0_i32_0 = arith.constant 0 : i32
    %c0_i32_1 = arith.constant 0 : i32
    return %c0_i32, %c0_i32_0 : i32, i32
  }
  func.func @transform_3(%arg0: i32, %arg1: i32) -> (i32, i32) {
    %c0_i32 = arith.constant 0 : i32
    %c0_i32_0 = arith.constant 0 : i32
    %c0_i32_1 = arith.constant 0 : i32
    return %c0_i32, %c0_i32_0 : i32, i32
  }
  func.func @transform_4(%arg0: i32, %arg1: i32) -> (i32, i32) {
    %c0_i32 = arith.constant 0 : i32
    %c0_i32_0 = arith.constant 0 : i32
    %c0_i32_1 = arith.constant 0 : i32
    return %c0_i32, %c0_i32_0 : i32, i32
  }
  func.func @transform_5(%arg0: i32, %arg1: i32) -> (i32, i32) {
    %c0_i32 = arith.constant 0 : i32
    %c0_i32_0 = arith.constant 0 : i32
    %c0_i32_1 = arith.constant 0 : i32
    return %c0_i32, %c0_i32_0 : i32, i32
  }
  func.func @transform_6(%arg0: i32, %arg1: i32) -> (i32, i32) {
    %c0_i32 = arith.constant 0 : i32
    %c0_i32_0 = arith.constant 0 : i32
    %c0_i32_1 = arith.constant 0 : i32
    return %c0_i32, %c0_i32_0 : i32, i32
  }
  func.func @transform_7(%arg0: i32, %arg1: i32) -> (i32, i32, i32) {
    %c0_i32 = arith.constant 0 : i32
    %c0_i32_0 = arith.constant 0 : i32
    return %arg0, %arg1, %c0_i32 : i32, i32, i32
  }
}

</mosaic_0001>

<bundles_post_ra>
// kernel: _lambda_.21
= control target key start
LH: loop header
LB: loop body
LE: loop exit
PB: predicated region body
PF: predicated region fallthrough
CT: control target
= control target key end

     0   :  { %8 = vsyncpa [#allocation3], 0  ;;  %s756_s0 = inlined_call_operand.vmem [shape: f32[2,8,64], index: 0, kind: input, shape index: {}]   ;;  %s757_s1 = inlined_call_operand.vmem [shape: bf16[64,128], index: 1, kind: input, shape index: {}]   ;;  %s758_s2 = inlined_call_operand.vmem [shape: f32[1,128], index: 2, kind: input, shape index: {}]   ;;  %s759_s3 = inlined_call_operand.hbm [shape: f32[2,8,128], index: 3, kind: output, shape index: {}]  }
   0x1   :  { %10 = vsyncpa [#allocation3 + $0x1], 0  ;;  %s629_s12 = smov 0   ;;  %s631_s13 = smov 0  }
   0x2   :  { %s633_s14 = smov 0   ;;  %s635_s15 = smov 0  }
   0x3   :  { %s637_s16 = smov 0   ;;  %s639_s17 = smov 0  }
   0x4 LB: > { %s425_s18 = sadd.s32 4294967295, %s604_s17   ;;  %s426_s19 = sadd.s32 4294967294, %s604_s17   ;;  %s604_s17 = sphi %s639_s17, %s16_s17   ;;  %s600_s16 = sphi %s637_s16, %s766_s16   ;;  %s596_s15 = sphi %s635_s15, %s765_s15   ;;  %s592_s14 = sphi %s633_s14, %s764_s14   ;;  %s588_s13 = sphi %s631_s13, %s763_s13   ;;  %s584_s12 = sphi %s629_s12, %s762_s12  }
   0x5   : > { %s28_s20 = sadd.s32 1, %s600_s16  ;;  %s115_s21 = sadd.s32 1, %s592_s14 }
   0x6   : > { %p30_p0 = scmp.ge.s32.totalorder %s28_s20, 2  ;;  %p125_p1 = scmp.ne.s32.totalorder %s592_s14, %s588_s13 }
   0x7   : > { %p126_p2 = scmp.eq.s32.totalorder %s425_s18, 1  ;;  %p131_p3 = scmp.ne.s32.totalorder %s588_s13, %s584_s12 }
   0x8   : > { %s768_s20 = smov (%p30_p0, %s28_s20), 0  ;;  %p132_p5 = scmp.eq.s32.totalorder %s426_s19, 1 }
   0x9   : > { %p669_p4 = por %p126_p2, %p125_p1  ;;  %s110_s23 = ssub.s32 %s600_s16, %s768_s20 }
   0xa   : > { %p431_p6 = scmp.ge.s32.totalorder %s604_s17, 1  ;;  %p113_p7 = scmp.eq.s32.totalorder %s110_s23, 0 }
   0xb   : > { %p676_p8 = por %p132_p5, %p131_p3  ;;  %p170_p9 = scmp.lt.s32.totalorder %s604_s17, 3 }
   0xc   : > { %s682_s25 = scalar_select %p113_p7, %s592_s14, %s115_s21  }
   0xd   : > { %p171_p10 = pnand %p431_p6, %p170_p9 }
   0xe   : > { %v518_v0 = vld [vmem:[%s757_s1] sm:$0xff] (!%p171_p10)   ;;  %v606_v1 = vmov (!%p171_p10), 0.0   ;;  %v519_v2 = vld [vmem:[%s757_s1 + $0x8] sm:$0xff] (!%p171_p10)   ;;  %vm607_vm0 = vmmov (!%p171_p10), 0   ;;  %p200_p11 = scmp.lt.s32.totalorder (!%p171_p10), %s596_s15, 1  ;;  %v520_v3 = vld [vmem:[%s757_s1 + $0x10] sm:$0xff] (!%p171_p10)  }
   0xf   : > { %174 = sbr.rel (%p171_p10) target bundleno = 311 (0x137), region = 32  ;;  %449 = vmatprep.subr.bf16.mxu0 (!%p171_p10), %v606_v1  ;;  %457 = vmatprep.mubr.msk.bf16.mxu0 (!%p171_p10), %vm607_vm0, %v606_v1  ;;  %v521_v4 = vld [vmem:[%s757_s1 + $0x18] sm:$0xff] (!%p171_p10)   ;;  %vm253_vm1 = vcmask (!%p171_p10), 523264   ;;  %v434_v7 = vld [vmem:[%s758_s2] ss:$0 sm:$0xff] (!%p171_p10)  ;;  %s197_s21 = sand.u32 (!%p171_p10), 1, %s588_s13  }
  0x10   : > { %450 = vmatpush3.bf16.msra.mxu0 (!%p171_p10), %v518_v0  ;;  %s432_s23 = sshll.u32 (!%p171_p10), %s197_s21, 3  ;;  %s441_s26 = sshll.u32 (!%p171_p10), %s596_s15, 7 }
  0x11   : > { %451 = vmatprep.subr.bf16.mxu0 (!%p171_p10), %v606_v1  ;;  %s199_s27 = scalar_lea.vmem (!%p171_p10), [#allocation2], %s432_s23  ;;  %s709_s4 = scalar_lea.hbm (!%p171_p10), %s759_s3, %s441_s26 }
  0x12   : > { %s330_s28 = sshll.u32 (!%p171_p10), %s199_s27, 4  ;;  %s316_s5 = scalar_lea.sflag (!%p171_p10), [#allocation3], %s197_s21  ;;  %s711_s28 = int_to_ptr.vmem [resolvable:$true] %s330_s28 }
  0x14   : > { %452 = vmatpush3.bf16.msra.mxu0 (!%p171_p10), %v519_v2 }
  0x15   : > { %453 = vmatprep.subr.bf16.mxu0 (!%p171_p10), %v606_v1 }
  0x16   : > { %s201_s30 = scalar_select %p200_p11, %s596_s15, 1 }
  0x17   : > { %s608_s15 = smov [#allocation2]  }
  0x18   : > { %s433_s6 = sshll.u32 %s201_s30, 3  ;;  %454 = vmatpush3.bf16.msra.mxu0 %v520_v3  ;;  %s530_s7 = sshll.u32 %s608_s15, 4  ;;  %s531_s7 = int_to_ptr.vmem [resolvable:$false] %s530_s7 }
  0x19   : > { %s203_s9 = scalar_lea.vmem %s756_s0, %s433_s6  ;;  %455 = vmatprep.subr.bf16.mxu0 %v606_v1  ;;  %s526_s6 = scalar_lea.vmem %s711_s28, 128 }
  0x1a   : > { %v212_v5 = vld [vmem:[%s203_s9] sm:$0xff]  ;;  %p527_p12 = scmp.ne.s32.totalorder %s711_s28, %s526_s6  ;;  %s532_s8 = scalar_lea.vmem %s531_s7, 256 }
  0x1b   : > { %v213_v6 = vpack.c.bf16 %v212_v5, %v212_v5  ;;  %p533_p1 = scmp.lt.s32.totalorder %s711_s28, %s531_s7  ;;  %p534_p2 = scmp.lt.s32.totalorder %s532_s8, %s526_s6 }
  0x1c   : > { %456 = vmatpush3.bf16.msra.mxu0 %v521_v4  ;;  %p528_p13 = pnand %p527_p12, %p669_p4 }
  0x1d   : > { %p535_p3 = por %p534_p2, %p533_p1 }
  0x1e   : > { %p529_p0 = pneg %p528_p13 }
  0x1f   : > { %458 = vmatmul.mubr.msk.bf16.vlgmr.msra.gmra.mrb[0].mxu0 %vm253_vm1, %v213_v6 }
  0x20   : > { %p536_p5 = pnand %p535_p3, %p529_p0 }
  0xf2   : > { %v291_v8 = vpop.f32.mrb[0].mxu0 }
  0xf3   : > { %v292_v9 = vadd.f32 %v434_v7, %v291_v8  ;;  %v459_v10 = vpop.f32.mrb[1].mxu0 }
  0xf4   : > { %v294_v11 = vpop.f32.mrb[2].mxu0 }
  0xf5   : > { %v297_v12 = vrot.slane %v292_v9, 4  ;;  %v460_v13 = vpop.f32.mrb[3].mxu0 }
  0xf7   : > { %v298_v14 = vmax.f32 %v292_v9, %v297_v12 }
  0xf9   : > { %v299_v15 = vrot.slane %v298_v14, 2 }
  0xfb   : > { %v300_v16 = vmax.f32 %v298_v14, %v299_v15 }
  0xfd   : > { %v301_v17 = vrot.slane %v300_v16, 1 }
  0xff   : > { %v302_v18 = vmax.f32 %v300_v16, %v301_v17 }
 0x101   : > { %v303_v19 = vsub.f32 %v292_v9, %v302_v18 }
 0x103   : > { %v304_v20 = vmul.f32 1.442695, %v303_v19 }
 0x105   : > { %522 = vpow2.f32 %v304_v20 }
 0x10f   : > { %v523_v21 = vpop.eup %522 }
 0x110   : > { %v306_v22 = vrot.slane %v523_v21, 4 }
 0x112   : > { %v307_v23 = vadd.f32 %v523_v21, %v306_v22 }
 0x114   : > { %v308_v24 = vrot.slane %v307_v23, 2 }
 0x116   : > { %v309_v25 = vadd.f32 %v308_v24, %v307_v23 }
 0x118   : > { %v310_v26 = vrot.slane %v309_v25, 1 }
 0x11a   : > { %v311_v27 = vadd.f32 %v310_v26, %v309_v25 }
 0x11c   : > { %524 = vrcp.f32 %v311_v27 }
 0x126   : > { %v525_v28 = vpop.eup %524 }
 0x127   : > { %v313_v29 = vmul.f32 %v525_v28, %v523_v21 }
 0x129   : > { %314 = vst [vmem:[%s199_s27] sm:$0xff] %v313_v29 }
 0x12a   : > { %539 = shalt.err (!%p536_p5)
}
 0x12b   : > { %s540_s9 = scalar_lea.hbm %s709_s4, 128  ;;  %s544_s18 = scalar_lea.hbm %s759_s3, 256 }
 0x12c   : > { %p541_p6 = scmp.ne.s32.totalorder %s709_s4, %s540_s9  ;;  %p545_p10 = scmp.lt.u32.totalorder %s709_s4, %s759_s3 }
 0x12d   : > { %p546_p11 = scmp.lt.u32.totalorder %s544_s18, %s540_s9  ;;  %p548_p13 = scmp.lt.u32.totalorder %s540_s9, %s709_s4 }
 0x12e   : > { %p542_p7 = pnand %p541_p6, %p669_p4 }
 0x12f   : > { %p547_p12 = por %p546_p11, %p545_p10 }
 0x130   : > { %p543_p9 = pneg %p542_p7 }
 0x131   : > { %p549_p0 = por %p548_p13, %p547_p12 }
 0x133   : > { %p550_p1 = pnand %p549_p0, %p543_p9 }
 0x135   : > { %553 = shalt.err (!%p550_p1)
}
 0x136   : > { %461 = dma.vmem_to_hbm [thread:$0]  (%p669_p4), %s711_s28, 128, %s709_s4, %s316_s5  }
 0x137 PF: > { %p467_p2 = scmp.ge.s32.totalorder %s604_s17, 2  ;;  %s342_s23 = sand.u32 1, %s584_s12  }
 0x138   : > { %s343_s26 = scalar_lea.sflag [#allocation3], %s342_s23 }
 0x139   : > { %p464_p3 = pnand %p467_p2, %p676_p8 }
 0x13b   : > { %579 = dma.done.wait (!%p464_p3), %s343_s26, 128  }
 0x13c   : > { %581 = vsyncadd (!%p464_p3), %s343_s26, 4294967168  ;;  %s16_s17 = sadd.s32 1, %s604_s17   ;;  %s762_s12 = smov %s588_s13 }
 0x13d   : > { %p13_p5 = scmp.ge.s32.totalorder %s16_s17, 4   ;;  %s763_s13 = smov %s592_s14 }
 0x13e   : > { %s764_s14 = smov %s682_s25  ;;  %s765_s15 = smov %s600_s16 }
 0x13f   : > { %s766_s16 = smov %s768_s20  ;;  %15 = sbr.rel (!%p13_p5) target bundleno = 4 (0x4), region = 73 }
 0x146   :  { %348 = vsyncpa [#allocation3], 1 }
 0x147   :  { %350 = vsyncpa [#allocation3 + $0x1], 1 }

// kernel: _lambda_.12
= control target key start
LH: loop header
LB: loop body
LE: loop exit
PB: predicated region body
PF: predicated region fallthrough
CT: control target
= control target key end

     0   :  { %s788_s24 = smov 0   ;;  %s790_s25 = smov 0   ;;  %s880_s0 = inlined_call_operand.vmem [shape: f32[2,8,64], index: 0, kind: input, shape index: {}]   ;;  %s881_s1 = inlined_call_operand.vmem [shape: bf16[64,128], index: 1, kind: input, shape index: {}]   ;;  %s882_s2 = inlined_call_operand.vmem [shape: f32[1,128], index: 2, kind: input, shape index: {}]   ;;  %s883_s3 = inlined_call_operand.vmem [shape: bf16[128,64], index: 3, kind: input, shape index: {}]   ;;  %s884_s4 = inlined_call_operand.vmem [shape: f32[1,64], index: 4, kind: input, shape index: {}]   ;;  %s885_s5 = inlined_call_operand.vmem [shape: f32[1,64], index: 5, kind: input, shape index: {}]   ;;  %s886_s6 = inlined_call_operand.vmem [shape: f32[1,64], index: 6, kind: input, shape index: {}]   ;;  %s887_s7 = inlined_call_operand.vmem [shape: f32[2,8,64], index: 7, kind: output, shape index: {}]  }
   0x1   :  { %s792_s26 = smov 0  }
   0x2 LB: > { %s29_s27 = sadd.s32 1, %s740_s25  ;;  %p614_p0 = scmp.ge.s32.totalorder %s744_s26, 1  ;;  %s744_s26 = sphi %s792_s26, %s17_s26   ;;  %s740_s25 = sphi %s790_s25, %s889_s25   ;;  %s736_s24 = sphi %s788_s24, %s888_s24  }
   0x3   : > { %p31_p1 = scmp.ge.s32.totalorder %s29_s27, 2  ;;  %p255_p2 = scmp.lt.s32.totalorder %s744_s26, 3 }
   0x5   : > { %s891_s27 = smov (%p31_p1, %s29_s27), 0  ;;  %p256_p3 = pnand %p614_p0, %p255_p2 }
   0x6   : > { %v708_v0 = vld [vmem:[%s881_s1] sm:$0xff] (!%p256_p3)   ;;  %v746_v1 = vmov (!%p256_p3), 0.0   ;;  %v709_v2 = vld [vmem:[%s881_s1 + $0x8] sm:$0xff] (!%p256_p3)   ;;  %vm747_vm0 = vmmov (!%p256_p3), 0   ;;  %p291_p4 = scmp.lt.s32.totalorder (!%p256_p3), %s736_s24, 1  ;;  %v710_v4 = vld [vmem:[%s881_s1 + $0x10] sm:$0xff] (!%p256_p3)  }
   0x7   : > { %259 = sbr.rel (%p256_p3) target bundleno = 771 (0x303), region = 48  ;;  %650 = vmatprep.subr.bf16.mxu0 (!%p256_p3), %v746_v1  ;;  %662 = vmatprep.subr.bf16.mxu1 (!%p256_p3), %v746_v1  ;;  %v712_v3 = vld [vmem:[%s883_s3] sm:$0xff] (!%p256_p3)   ;;  %v713_v5 = vld [vmem:[%s883_s3 + $0x8] sm:$0xff] (!%p256_p3)   ;;  %v711_v6 = vld [vmem:[%s881_s1 + $0x18] sm:$0xff] (!%p256_p3)   ;;  %vm347_vm1 = vcmask (!%p256_p3), 523264  }
   0x8   : > { %651 = vmatpush3.bf16.msra.mxu0 (!%p256_p3), %v708_v0  ;;  %658 = vmatprep.mubr.msk.bf16.mxu0 (!%p256_p3), %vm747_vm0, %v746_v1  ;;  %v714_v8 = vld [vmem:[%s883_s3 + $0x10] sm:$0xff] (!%p256_p3)   ;;  %v715_v10 = vld [vmem:[%s883_s3 + $0x18] sm:$0xff] (!%p256_p3)   ;;  %v716_v11 = vld [vmem:[%s883_s3 + $0x20] sm:$0xff] (!%p256_p3)  }
   0x9   : > { %652 = vmatprep.subr.bf16.mxu0 (!%p256_p3), %v746_v1  ;;  %678 = vmatprep.mubr.msk.bf16.mxu1 (!%p256_p3), %vm747_vm0, %v746_v1  ;;  %v717_v12 = vld [vmem:[%s883_s3 + $0x28] sm:$0xff] (!%p256_p3)   ;;  %v718_v13 = vld [vmem:[%s883_s3 + $0x30] sm:$0xff] (!%p256_p3)   ;;  %v719_v14 = vld [vmem:[%s883_s3 + $0x38] sm:$0xff] (!%p256_p3)  }
   0xa   : > { %663 = vmatpush3.bf16.msra.mxu1 (!%p256_p3), %v712_v3  ;;  %v617_v15 = vld [vmem:[%s882_s2] ss:$0 sm:$0xff] (!%p256_p3) }
   0xb   : > { %664 = vmatprep.subr.bf16.mxu1 (!%p256_p3), %v746_v1  ;;  %v623_v23 = vld [vmem:[%s884_s4] ss:$0 sm:$0xff] (!%p256_p3) }
   0xc   : > { %653 = vmatpush3.bf16.msra.mxu0 (!%p256_p3), %v709_v2  ;;  %v632_v40 = vld [vmem:[%s885_s5] ss:$0 sm:$0xff] (!%p256_p3) }
   0xd   : > { %654 = vmatprep.subr.bf16.mxu0 (!%p256_p3), %v746_v1  ;;  %v633_v42 = vld [vmem:[%s886_s6] ss:$0 sm:$0xff] (!%p256_p3) }
   0xe   : > { %s893_s24 = smov (!%p291_p4, %s736_s24), 1  ;;  %665 = vmatpush3.bf16.msra.mxu1 %v713_v5 }
   0xf   : > { %s615_s13 = sshll.u32 %s893_s24, 3  ;;  %666 = vmatprep.subr.bf16.mxu1 %v746_v1 }
  0x10   : > { %s297_s18 = scalar_lea.vmem %s880_s0, %s615_s13  ;;  %655 = vmatpush3.bf16.msra.mxu0 %v710_v4  ;;  %s304_s29 = scalar_lea.vmem %s887_s7, %s615_s13 }
  0x11   : > { %v306_v7 = vld [vmem:[%s297_s18] sm:$0xff]  ;;  %656 = vmatprep.subr.bf16.mxu0 %v746_v1 }
  0x12   : > { %v307_v9 = vpack.c.bf16 %v306_v7, %v306_v7  ;;  %667 = vmatpush3.bf16.msra.mxu1 %v714_v8 }
  0x13   : > { %668 = vmatprep.subr.bf16.mxu1 %v746_v1 }
  0x14   : > { %657 = vmatpush3.bf16.msra.mxu0 %v711_v6 }
  0x16   : > { %669 = vmatpush3.bf16.msra.mxu1 %v715_v10 }
  0x17   : > { %659 = vmatmul.mubr.msk.bf16.vlgmr.msra.gmra.mrb[0].mxu0 %vm347_vm1, %v307_v9  ;;  %670 = vmatprep.subr.bf16.mxu1 %v746_v1 }
  0x1a   : > { %671 = vmatpush3.bf16.msra.mxu1 %v716_v11 }
  0x1b   : > { %672 = vmatprep.subr.bf16.mxu1 %v746_v1 }
  0x1e   : > { %673 = vmatpush3.bf16.msra.mxu1 %v717_v12 }
  0x1f   : > { %674 = vmatprep.subr.bf16.mxu1 %v746_v1 }
  0x22   : > { %675 = vmatpush3.bf16.msra.mxu1 %v718_v13 }
  0x23   : > { %676 = vmatprep.subr.bf16.mxu1 %v746_v1 }
  0x26   : > { %677 = vmatpush3.bf16.msra.mxu1 %v719_v14 }
  0xea   : > { %v385_v16 = vpop.f32.mrb[0].mxu0 }
  0xeb   : > { %v386_v17 = vadd.f32 %v617_v15, %v385_v16  ;;  %v660_v18 = vpop.f32.mrb[1].mxu0 }
  0xec   : > { %v388_v19 = vpop.f32.mrb[2].mxu0 }
  0xed   : > { %v391_v20 = vmax.f32 %v386_v17, 0.0  ;;  %v661_v21 = vpop.f32.mrb[3].mxu0 }
  0xef   : > { %v392_v22 = vpack.c.bf16 %v391_v20, %v391_v20 }
  0xf1   : > { %679 = vmatmul.mubr.bf16.vlgmr.msra.gmra.mrb[0].mxu1 %v392_v22 }
 0x1c4   : > { %v498_v24 = vpop.f32.mrb[0].mxu1 }
 0x1c5   : > { %v499_v25 = vadd.f32 %v623_v23, %v498_v24  ;;  %v680_v26 = vpop.f32.mrb[1].mxu1 }
 0x1c6   : > { %v501_v27 = vpop.f32.mrb[2].mxu1 }
 0x1c7   : > { %v681_v28 = vpop.f32.mrb[3].mxu1  ;;  %v506_v29 = vadd.f32 %v499_v25, %v306_v7 }
 0x1c9   : > { %v507_v30 = vsel %vm347_vm1, %v506_v29, 0.0 }
 0x1ca   : > { %508 = vadd.xlane.f32.xlu0 %v507_v30 }
 0x257   : > { %v509_v31 = vpop.xlane.xlu0 %508 }
 0x258   : > { %v511_v32 = vmul.f32 0.015625, %v509_v31 }
 0x25a   : > { %v512_v33 = vsub.f32 %v506_v29, %v511_v32 }
 0x25c   : > { %v513_v34 = vmul.f32 %v512_v33, %v512_v33 }
 0x25e   : > { %v514_v35 = vsel %vm347_vm1, %v513_v34, 0.0 }
 0x25f   : > { %515 = vadd.xlane.f32.xlu0 %v514_v35 }
 0x2ec   : > { %v516_v36 = vpop.xlane.xlu0 %515 }
 0x2ed   : > { %v517_v37 = vmul.f32 0.015625, %v516_v36 }
 0x2ef   : > { %v518_v38 = vadd.f32 1e-05, %v517_v37 }
 0x2f1   : > { %720 = vrsqrt.f32 %v518_v38 }
 0x2fb   : > { %v721_v39 = vpop.eup %720 }
 0x2fc   : > { %v520_v41 = vmul.f32 %v721_v39, %v512_v33 }
 0x2fe   : > { %v527_v43 = vmul.f32 %v632_v40, %v520_v41 }
 0x300   : > { %v534_v44 = vadd.f32 %v633_v42, %v527_v43 }
 0x302   : > { %535 = vst.msk [vmem:[%s304_s29] sm:$0xff] %vm347_vm1, %v534_v44 }
 0x303 PF: > { %s17_s26 = sadd.s32 1, %s744_s26   ;;  %s888_s24 = smov %s740_s25 }
 0x304   : > { %p14_p5 = scmp.ge.s32.totalorder %s17_s26, 4   ;;  %s889_s25 = smov %s891_s27 }
 0x306   :  { %16 = sbr.rel (!%p14_p5) target bundleno = 2 (0x2), region = 78 }

// kernel: _lambda_.11
= control target key start
LH: loop header
LB: loop body
LE: loop exit
PB: predicated region body
PF: predicated region fallthrough
CT: control target
= control target key end

     0   :  { %s2284_s21 = smov 0   ;;  %s2286_s22 = smov 0   ;;  %s2569_s0 = inlined_call_operand.vmem [shape: f32[2,8,64], index: 0, kind: input, shape index: {}, may-alias: {0,1}]   ;;  %s2570_s1 = inlined_call_operand.vmem [shape: f32[2,8,64], index: 1, kind: input, shape index: {}, may-alias: {0,1}]   ;;  %s2571_s2 = inlined_call_operand.vmem [shape: bf16[64,64], index: 2, kind: input, shape index: {}]   ;;  %s2572_s3 = inlined_call_operand.vmem [shape: f32[1,64], index: 3, kind: input, shape index: {}]   ;;  %s2573_s4 = inlined_call_operand.vmem [shape: bf16[64,64], index: 4, kind: input, shape index: {}]   ;;  %s2574_s5 = inlined_call_operand.vmem [shape: f32[1,64], index: 5, kind: input, shape index: {}]   ;;  %s2575_s6 = inlined_call_operand.vmem [shape: bf16[64,64], index: 6, kind: input, shape index: {}]   ;;  %s2576_s7 = inlined_call_operand.vmem [shape: f32[1,64], index: 7, kind: input, shape index: {}]   ;;  %s2577_s8 = inlined_call_operand.vmem [shape: bf16[64,64], index: 8, kind: input, shape index: {}]   ;;  %s2578_s9 = inlined_call_operand.vmem [shape: f32[1,64], index: 9, kind: input, shape index: {}]   ;;  %s2579_s10 = inlined_call_operand.vmem [shape: f32[1,64], index: 10, kind: input, shape index: {}]   ;;  %s2580_s11 = inlined_call_operand.vmem [shape: f32[1,64], index: 11, kind: input, shape index: {}]   ;;  %s2581_s12 = inlined_call_operand.vmem [shape: f32[2,8,64], index: 12, kind: output, shape index: {}]  }
   0x1   :  { %s2288_s23 = smov 0  }
   0x2 LB: > { %s34_s24 = sadd.s32 1, %s2203_s22  ;;  %p1937_p0 = scmp.ge.s32.totalorder %s2207_s23, 1  ;;  %s2207_s23 = sphi %s2288_s23, %s22_s23   ;;  %s2203_s22 = sphi %s2286_s22, %s2583_s22   ;;  %s2199_s21 = sphi %s2284_s21, %s2582_s21  }
   0x3   : > { %p36_p1 = scmp.ge.s32.totalorder %s34_s24, 2  ;;  %p389_p2 = scmp.lt.s32.totalorder %s2207_s23, 3 }
   0x5   : > { %s2585_s24 = smov (%p36_p1, %s34_s24), 0  ;;  %p390_p3 = pnand %p1937_p0, %p389_p2 }
   0x6   : > { %v2151_v0 = vld [vmem:[%s2573_s4] sm:$0xff] (!%p390_p3)   ;;  %v2209_v1 = vmov (!%p390_p3), 0.0   ;;  %v2153_v3 = vld [vmem:[%s2573_s4 + $0x8] sm:$0xff] (!%p390_p3)   ;;  %vm2210_vm0 = vmmov (!%p390_p3), 0   ;;  %p439_p4 = scmp.lt.s32.totalorder (!%p390_p3), %s2199_s21, 1  ;;  %v2155_v5 = vld [vmem:[%s2573_s4 + $0x10] sm:$0xff] (!%p390_p3)   ;;  %v721_v31 = vlaneseq (!%p390_p3) }
   0x7   : > { %393 = sbr.rel (%p390_p3) target bundleno = 1857 (0x741), region = 68  ;;  %2033 = vmatprep.subr.bf16.mxu1 (!%p390_p3), %v2209_v1  ;;  %2021 = vmatprep.subr.bf16.mxu0 (!%p390_p3), %v2209_v1  ;;  %v2152_v2 = vld [vmem:[%s2571_s2] sm:$0xff] (!%p390_p3)   ;;  %v2154_v4 = vld [vmem:[%s2571_s2 + $0x8] sm:$0xff] (!%p390_p3)   ;;  %v2156_v6 = vld [vmem:[%s2571_s2 + $0x10] sm:$0xff] (!%p390_p3)   ;;  %vm501_vm1 = vcmask (!%p390_p3), 523264   ;;  %s2211_s20 = smov (!%p390_p3), 80  }
   0x8   : > { %2034 = vmatpush3.bf16.msra.mxu1 (!%p390_p3), %v2151_v0  ;;  %2041 = vmatprep.mubr.msk.bf16.mxu1 (!%p390_p3), %vm2210_vm0, %v2209_v1  ;;  %v2157_v7 = vld [vmem:[%s2573_s4 + $0x18] sm:$0xff] (!%p390_p3)   ;;  %v1947_v13 = vld [vmem:[%s2574_s5] ss:$0 sm:$0xff] (!%p390_p3)  ;;  %s2212_s25 = smov (!%p390_p3), 112   ;;  %v2160_v26 = vld [vmem:[%s2575_s6 + $0x8] sm:$0xff] (!%p390_p3)   ;;  %v722_v35 = vshrl.u32 (!%p390_p3), %v721_v31, 7 }
   0x9   : > { %2035 = vmatprep.subr.bf16.mxu1 (!%p390_p3), %v2209_v1  ;;  %2022 = vmatpush3.bf16.msra.mxu0 (!%p390_p3), %v2152_v2  ;;  %v2158_v9 = vld [vmem:[%s2571_s2 + $0x18] sm:$0xff] (!%p390_p3)   ;;  %v1941_v15 = vld [vmem:[%s2572_s3] ss:$0 sm:$0xff] (!%p390_p3)  ;;  %v2161_v27 = vld [vmem:[%s2575_s6 + $0x10] sm:$0xff] (!%p390_p3)   ;;  %v2214_v29 = vmov (!%p390_p3), 1983009808  }
   0xa   : > { %2023 = vmatprep.subr.bf16.mxu0 (!%p390_p3), %v2209_v1  ;;  %2029 = vmatprep.mubr.msk.bf16.mxu0 (!%p390_p3), %vm2210_vm0, %v2209_v1  ;;  %v2159_v25 = vld [vmem:[%s2575_s6] sm:$0xff] (!%p390_p3)   ;;  %v2162_v28 = vld [vmem:[%s2575_s6 + $0x18] sm:$0xff] (!%p390_p3)   ;;  %v719_v30 = vunpack.c.l.s4 (!%p390_p3), %v2214_v29  ;;  %v2215_v32 = vmov (!%p390_p3), 1934713408   ;;  %vm1156_vm2 = vcmask (!%p390_p3), 130048   ;;  %vm1345_vm3 = vcmask (!%p390_p3), 64512  }
   0xb   : > { %v751_v33 = vunpack.c.l.s4 (!%p390_p3), %v2215_v32  ;;  %vm1397_vm4 = vcmask (!%p390_p3), 1043456   ;;  %s2217_s13 = smov (!%p390_p3), 16   ;;  %s2218_s14 = smov (!%p390_p3), 48   ;;  %vm1728_vm5 = vcmask (!%p390_p3), 261120   ;;  %vm1730_vm6 = vcmask (!%p390_p3), 392192  }
   0xc   : > { %2036 = vmatpush3.bf16.msra.mxu1 (!%p390_p3), %v2153_v3  ;;  %v720_v34 = vunpack.c.0.s8 (!%p390_p3), %v719_v30 }
   0xd   : > { %2037 = vmatprep.subr.bf16.mxu1 (!%p390_p3), %v2209_v1  ;;  %2024 = vmatpush3.bf16.msra.mxu0 (!%p390_p3), %v2154_v4  ;;  %v752_v38 = vunpack.c.0.s8 (!%p390_p3), %v751_v33 }
   0xe   : > { %s2587_s21 = smov (!%p439_p4, %s2199_s21), 1  ;;  %2025 = vmatprep.subr.bf16.mxu0 %v2209_v1  ;;  %v2391_v39 = vsub.s32 %v720_v34, %v722_v35 }
   0xf   : > { %s2325_s17 = sshll.u32 %s2587_s21, 3  ;;  %v2393_v46 = vsub.s32 %v752_v38, %v722_v35 }
  0x10   : > { %s449_s26 = scalar_lea.vmem %s2570_s1, %s2325_s17  ;;  %s445_s30 = scalar_lea.vmem %s2569_s0, %s2325_s17  ;;  %2038 = vmatpush3.bf16.msra.mxu1 %v2155_v5 }
  0x11   : > { %v459_v8 = vld [vmem:[%s449_s26] sm:$0xff]  ;;  %2039 = vmatprep.subr.bf16.mxu1 %v2209_v1  ;;  %2026 = vmatpush3.bf16.msra.mxu0 %v2156_v6  ;;  %s2213_s26 = smov 96   ;;  %s456_s28 = scalar_lea.vmem %s2581_s12, %s2325_s17 }
  0x12   : > { %v2346_v10 = vld [vmem:[%s445_s30] sm:$0xff]  ;;  %2027 = vmatprep.subr.bf16.mxu0 %v2209_v1  ;;  %v461_v11 = vpack.c.bf16 %v459_v8, %v459_v8  ;;  %s2216_s30 = smov 32  }
  0x13   : > { %v460_v12 = vpack.c.bf16 %v2346_v10, %v2346_v10 }
  0x14   : > { %2040 = vmatpush3.bf16.msra.mxu1 %v2157_v7 }
  0x15   : > { %2028 = vmatpush3.bf16.msra.mxu0 %v2158_v9  ;;  %2057 = vmatprep.subr.bf16.mxu1 %v2209_v1 }
  0x16   : > { %2045 = vmatprep.subr.bf16.mxu0 %v2209_v1 }
  0x17   : > { %2042 = vmatmul.mubr.msk.bf16.vlgmr.msra.gmra.mrb[0].mxu1 %vm501_vm1, %v461_v11 }
  0x18   : > { %2030 = vmatmul.mubr.msk.bf16.vlgmr.msra.gmra.mrb[0].mxu0 %vm501_vm1, %v460_v12  ;;  %2059 = vmatprep.mubr.msk.bf16.mxu1 %vm2210_vm0, %v2209_v1 }
  0x19   : > { %2053 = vmatprep.mubr.msk.bf16.mxu0 %vm2210_vm0, %v2209_v1  ;;  %2046 = vmatpush3.bf16.msra.mxu0 %v2159_v25 }
  0x1a   : > { %2047 = vmatprep.subr.bf16.mxu0 %v2209_v1 }
  0x1d   : > { %2048 = vmatpush3.bf16.msra.mxu0 %v2160_v26 }
  0x1e   : > { %2049 = vmatprep.subr.bf16.mxu0 %v2209_v1 }
  0x21   : > { %2050 = vmatpush3.bf16.msra.mxu0 %v2161_v27 }
  0x22   : > { %2051 = vmatprep.subr.bf16.mxu0 %v2209_v1 }
  0x25   : > { %2052 = vmatpush3.bf16.msra.mxu0 %v2162_v28 }
  0x26   : > { %2081 = vmatprep.subr.bf16.mxu0 %v2209_v1 }
  0x28   : > { %2054 = vmatmul.mubr.msk.bf16.vlgmr.msra.gmra.mrb[4].mxu0 %vm501_vm1, %v461_v11 }
  0x29   : > { %2083 = vmatprep.mubr.msk.bf16.mxu0 %vm2210_vm0, %v2209_v1 }
  0xea   : > { %v621_v14 = vpop.f32.mrb[0].mxu1 }
  0xeb   : > { %v622_v16 = vadd.f32 %v1947_v13, %v621_v14  ;;  %v2043_v17 = vpop.f32.mrb[1].mxu1  ;;  %v539_v18 = vpop.f32.mrb[0].mxu0 }
  0xec   : > { %v624_v19 = vpop.f32.mrb[2].mxu1  ;;  %v2031_v20 = vpop.f32.mrb[1].mxu0  ;;  %v540_v22 = vadd.f32 %v1941_v15, %v539_v18 }
  0xed   : > { %863 = vrot.lane.b32.xlu1 %v622_v16, %s2211_s20  ;;  %857 = vrot.lane.b32.xlu0 %v622_v16, %s2212_s25  ;;  %v2044_v21 = vpop.f32.mrb[3].mxu1  ;;  %v542_v23 = vpop.f32.mrb[2].mxu0 }
  0xee   : > { %v2032_v24 = vpop.f32.mrb[3].mxu0 }
  0xf1   : > { %860 = vrot.lane.b32.xlu0 %v622_v16, %s2213_s26  ;;  %707 = vrot.lane.b32.xlu1 %v540_v22, %s2212_s25 }
  0xf5   : > { %710 = vrot.lane.b32.xlu0 %v540_v22, %s2213_s26  ;;  %713 = vrot.lane.b32.xlu1 %v540_v22, %s2211_s20 }
 0x15f   : > { %v864_v36 = vpop.permute.xlu1 %863  ;;  %v858_v37 = vpop.permute.xlu0 %857 }
 0x160   : > { %v882_v40 = vcombine.low %v858_v37, %v864_v36  ;;  %v883_v41 = vcombine.high %v858_v37, %v864_v36 }
 0x162   : > { %v890_v47 = vrot.slane %v882_v40, %v2391_v39  ;;  %v897_v48 = vrot.slane %v883_v41, %v2391_v39 }
 0x163   : > { %v861_v42 = vpop.permute.xlu0 %860  ;;  %v708_v43 = vpop.permute.xlu1 %707 }
 0x164   : > { %v866_v44 = vcombine.low %v622_v16, %v861_v42  ;;  %v867_v45 = vcombine.high %v622_v16, %v861_v42 }
 0x166   : > { %v874_v49 = vrot.slane %v866_v44, %v2391_v39  ;;  %v881_v50 = vrot.slane %v867_v45, %v2391_v39 }
 0x167   : > { %v711_v51 = vpop.permute.xlu0 %710  ;;  %v714_v52 = vpop.permute.xlu1 %713 }
 0x168   : > { %v898_v53 = vcombine.low %v874_v49, %v890_v47  ;;  %v899_v54 = vcombine.high %v874_v49, %v890_v47  ;;  %v914_v55 = vcombine.low %v881_v50, %v897_v48  ;;  %v915_v56 = vcombine.high %v881_v50, %v897_v48 }
 0x169   : > { %v716_v57 = vcombine.low %v540_v22, %v711_v51  ;;  %v717_v58 = vcombine.high %v540_v22, %v711_v51  ;;  %v732_v59 = vcombine.low %v708_v43, %v714_v52  ;;  %v733_v60 = vcombine.high %v708_v43, %v714_v52 }
 0x16a   : > { %v906_v61 = vrot.slane %v898_v53, %v2393_v46  ;;  %v913_v62 = vrot.slane %v899_v54, %v2393_v46  ;;  %v922_v63 = vrot.slane %v914_v55, %v2393_v46  ;;  %v929_v0 = vrot.slane %v915_v56, %v2393_v46 }
 0x16b   : > { %v724_v2 = vrot.slane %v716_v57, %v2391_v39  ;;  %v731_v3 = vrot.slane %v717_v58, %v2391_v39  ;;  %v740_v4 = vrot.slane %v732_v59, %v2391_v39  ;;  %v747_v5 = vrot.slane %v733_v60, %v2391_v39 }
 0x16c   : > { %v934_v6 = vcombine.low %v906_v61, %v913_v62  ;;  %v1961_v7 = vcombine.high %v906_v61, %v913_v62  ;;  %v950_v8 = vcombine.low %v922_v63, %v929_v0  ;;  %v1962_v9 = vcombine.high %v922_v63, %v929_v0 }
 0x16d   : > { %v748_v11 = vcombine.low %v724_v2, %v740_v4  ;;  %v749_v12 = vcombine.high %v724_v2, %v740_v4  ;;  %v764_v13 = vcombine.low %v731_v3, %v747_v5  ;;  %v765_v14 = vcombine.high %v731_v3, %v747_v5 }
 0x16e   : > { %v941_v15 = vrot.slane %v934_v6, %v2391_v39  ;;  %v949_v16 = vrot.slane %v1961_v7, %v2391_v39  ;;  %v957_v17 = vrot.slane %v950_v8, %v2391_v39  ;;  %v965_v18 = vrot.slane %v1962_v9, %v2391_v39  ;;  %v700_v6 = vpop.f32.mrb[4].mxu0 }
 0x16f   : > { %v756_v19 = vrot.slane %v748_v11, %v2393_v46  ;;  %v763_v20 = vrot.slane %v749_v12, %v2393_v46  ;;  %v772_v21 = vrot.slane %v764_v13, %v2393_v46  ;;  %v779_v22 = vrot.slane %v765_v14, %v2393_v46  ;;  %v2055_v7 = vpop.f32.mrb[5].mxu0 }
 0x170   : > { %v966_v23 = vcombine.low %v941_v15, %v949_v16  ;;  %v982_v24 = vcombine.low %v957_v17, %v965_v18  ;;  %v967_v44 = vcombine.high %v941_v15, %v949_v16  ;;  %v983_v45 = vcombine.high %v957_v17, %v965_v18  ;;  %v703_v8 = vpop.f32.mrb[6].mxu0 }
 0x171   : > { %v784_v25 = vcombine.low %v756_v19, %v763_v20  ;;  %v1959_v26 = vcombine.high %v756_v19, %v763_v20  ;;  %v800_v27 = vcombine.low %v772_v21, %v779_v22  ;;  %v1960_v28 = vcombine.high %v772_v21, %v779_v22  ;;  %v2056_v9 = vpop.f32.mrb[7].mxu0 }
 0x172   : > { %v974_v29 = vrot.slane %v966_v23, %v2393_v46  ;;  %v990_v30 = vrot.slane %v982_v24, %v2393_v46  ;;  %v981_v49 = vrot.slane %v967_v44, %v2393_v46  ;;  %v997_v50 = vrot.slane %v983_v45, %v2393_v46 }
 0x173   : > { %v791_v31 = vrot.slane %v784_v25, %v2391_v39  ;;  %v799_v32 = vrot.slane %v1959_v26, %v2391_v39  ;;  %v807_v33 = vrot.slane %v800_v27, %v2391_v39  ;;  %v815_v34 = vrot.slane %v1960_v28, %v2391_v39 }
 0x174   : > { %v998_v35 = vcombine.low %v974_v29, %v990_v30  ;;  %v999_v43 = vcombine.high %v974_v29, %v990_v30  ;;  %v1000_v53 = vcombine.low %v981_v49, %v997_v50  ;;  %v1001_v62 = vcombine.high %v981_v49, %v997_v50  ;;  %v1953_v29 = vld [vmem:[%s2576_s7] ss:$0 sm:$0xff] }
 0x175   : > { %v816_v36 = vcombine.low %v791_v31, %v799_v32  ;;  %v832_v37 = vcombine.low %v807_v33, %v815_v34  ;;  %v817_v54 = vcombine.high %v791_v31, %v799_v32  ;;  %v833_v55 = vcombine.high %v807_v33, %v815_v34 }
 0x176   : > { %v1002_v38 = vpack.c.bf16 %v998_v35, %v998_v35  ;;  %v1003_v48 = vpack.c.bf16 %v999_v43, %v999_v43  ;;  %v1004_v57 = vpack.c.bf16 %v1000_v53, %v1000_v53  ;;  %v1005_v0 = vpack.c.bf16 %v1001_v62, %v1001_v62 }
 0x177   : > { %v824_v40 = vrot.slane %v816_v36, %v2393_v46  ;;  %v840_v41 = vrot.slane %v832_v37, %v2393_v46  ;;  %v831_v59 = vrot.slane %v817_v54, %v2393_v46  ;;  %v847_v60 = vrot.slane %v833_v55, %v2393_v46 }
 0x178   : > { %v1161_v42 = vsel %vm1156_vm2, %v1002_v38, 0  ;;  %v1207_v52 = vsel %vm1156_vm2, %v1003_v48, 0  ;;  %v1253_v61 = vsel %vm1156_vm2, %v1004_v57, 0  ;;  %v1299_v3 = vsel %vm1156_vm2, %v1005_v0, 0 }
 0x179   : > { %2058 = vmatpush3.bf16.xpose.msra.mxu1 %v1161_v42  ;;  %v848_v47 = vcombine.low %v824_v40, %v840_v41  ;;  %v849_v56 = vcombine.high %v824_v40, %v840_v41  ;;  %v850_v63 = vcombine.low %v831_v59, %v847_v60  ;;  %v851_v4 = vcombine.high %v831_v59, %v847_v60 }
 0x17a   : > { %2063 = vmatprep.subr.bf16.mxu1 %v2209_v1  ;;  %v701_v33 = vadd.f32 %v1953_v29, %v700_v6 }
 0x17b   : > { %v852_v51 = vpack.c.bf16 %v848_v47, %v848_v47  ;;  %v853_v58 = vpack.c.bf16 %v849_v56, %v849_v56  ;;  %v854_v2 = vpack.c.bf16 %v850_v63, %v850_v63  ;;  %v855_v5 = vpack.c.bf16 %v851_v4, %v851_v4 }
 0x180   : > { %2060 = vmatmul.mubr.msk.bf16.vlgmr.msra.gmra.mrb[4].mxu1 %vm1156_vm2, %v852_v51 }
 0x181   : > { %2064 = vmatpush3.bf16.xpose.msra.mxu1 %v1207_v52  ;;  %2065 = vmatprep.mubr.msk.bf16.mxu1 %vm2210_vm0, %v2209_v1 }
 0x182   : > { %2069 = vmatprep.subr.bf16.mxu1 %v2209_v1 }
 0x188   : > { %2066 = vmatmul.mubr.msk.bf16.vlgmr.msra.gmra.mrb[8].mxu1 %vm1156_vm2, %v853_v58 }
 0x189   : > { %2070 = vmatpush3.bf16.xpose.msra.mxu1 %v1253_v61  ;;  %2071 = vmatprep.mubr.msk.bf16.mxu1 %vm2210_vm0, %v2209_v1 }
 0x18a   : > { %2075 = vmatprep.subr.bf16.mxu1 %v2209_v1 }
 0x190   : > { %2072 = vmatmul.mubr.msk.bf16.vlgmr.msra.gmra.mrb[12].mxu1 %vm1156_vm2, %v854_v2 }
 0x191   : > { %2076 = vmatpush3.bf16.xpose.msra.mxu1 %v1299_v3  ;;  %2077 = vmatprep.mubr.msk.bf16.mxu1 %vm2210_vm0, %v2209_v1 }
 0x192   : > { %2087 = vmatprep.subr.bf16.mxu1 %v2209_v1 }
 0x198   : > { %2078 = vmatmul.mubr.msk.bf16.vlgmr.msra.gmra.mrb[16].mxu1 %vm1156_vm2, %v855_v5 }
 0x199   : > { %2089 = vmatprep.mubr.msk.bf16.mxu1 %vm2210_vm0, %v2209_v1 }
 0x253   : > { %v1197_v11 = vpop.f32.mrb[4].mxu1 }
 0x254   : > { %v1341_v12 = vmul.f32 0.25, %v1197_v11  ;;  %v2061_v13 = vpop.f32.mrb[5].mxu1 }
 0x255   : > { %v1200_v14 = vpop.f32.mrb[6].mxu1 }
 0x256   : > { %v2062_v15 = vpop.f32.mrb[7].mxu1  ;;  %v1346_v16 = vsel %vm1345_vm3, %v1341_v12, -inf }
 0x257   : > { %1347 = vmax.xlane.f32.xlu0 %v1346_v16 }
 0x25b   : > { %v1243_v17 = vpop.f32.mrb[8].mxu1 }
 0x25c   : > { %v1342_v18 = vmul.f32 0.25, %v1243_v17  ;;  %v2067_v19 = vpop.f32.mrb[9].mxu1 }
 0x25d   : > { %v1246_v20 = vpop.f32.mrb[10].mxu1 }
 0x25e   : > { %v2068_v21 = vpop.f32.mrb[11].mxu1  ;;  %v1349_v22 = vsel %vm1345_vm3, %v1342_v18, -inf }
 0x25f   : > { %1350 = vmax.xlane.f32.xlu1 %v1349_v22 }
 0x263   : > { %v1289_v23 = vpop.f32.mrb[12].mxu1 }
 0x264   : > { %v1343_v24 = vmul.f32 0.25, %v1289_v23  ;;  %v2073_v25 = vpop.f32.mrb[13].mxu1 }
 0x265   : > { %v1292_v26 = vpop.f32.mrb[14].mxu1 }
 0x266   : > { %v2074_v27 = vpop.f32.mrb[15].mxu1  ;;  %v1352_v28 = vsel %vm1345_vm3, %v1343_v24, -inf }
 0x267   : > { %1353 = vmax.xlane.f32.xlu0 %v1352_v28 }
 0x26b   : > { %v1335_v30 = vpop.f32.mrb[16].mxu1 }
 0x26c   : > { %v1344_v31 = vmul.f32 0.25, %v1335_v30  ;;  %v2079_v32 = vpop.f32.mrb[17].mxu1 }
 0x26d   : > { %v1338_v34 = vpop.f32.mrb[18].mxu1 }
 0x26e   : > { %v2080_v35 = vpop.f32.mrb[19].mxu1  ;;  %v1355_v36 = vsel %vm1345_vm3, %v1344_v31, -inf }
 0x26f   : > { %1356 = vmax.xlane.f32.xlu0 %v1355_v36 }
 0x270   : > { %1007 = vrot.lane.b32.xlu1 %v701_v33, %s2212_s25 }
 0x2e4   : > { %v1348_v37 = vpop.xlane.xlu0 %1347 }
 0x2e5   : > { %v1358_v38 = vsub.f32 %v1341_v12, %v1348_v37 }
 0x2e7   : > { %v1362_v40 = vmul.f32 1.442695, %v1358_v38 }
 0x2e9   : > { %2167 = vpow2.f32 %v1362_v40 }
 0x2ec   : > { %v1351_v41 = vpop.xlane.xlu1 %1350 }
 0x2ed   : > { %v1359_v42 = vsub.f32 %v1342_v18, %v1351_v41 }
 0x2ef   : > { %v1364_v43 = vmul.f32 1.442695, %v1359_v42 }
 0x2f0   : > { %v1008_v59 = vpop.permute.xlu1 %1007 }
 0x2f1   : > { %2169 = vpow2.f32 %v1364_v43 }
 0x2f3   : > { %v2455_v44 = vpop.eup %2167 }
 0x2f4   : > { %v1370_v45 = vsel %vm1345_vm3, %v2455_v44, 0.0  ;;  %v1354_v49 = vpop.xlane.xlu0 %1353 }
 0x2f5   : > { %1371 = vadd.xlane.f32.xlu1 %v1370_v45  ;;  %v1360_v50 = vsub.f32 %v1343_v24, %v1354_v49 }
 0x2f7   : > { %v1366_v51 = vmul.f32 1.442695, %v1360_v50 }
 0x2f9   : > { %2171 = vpow2.f32 %v1366_v51 }
 0x2fb   : > { %v2459_v47 = vpop.eup %2169 }
 0x2fc   : > { %v1373_v48 = vsel %vm1345_vm3, %v2459_v47, 0.0  ;;  %v1357_v52 = vpop.xlane.xlu0 %1356 }
 0x2fd   : > { %1374 = vadd.xlane.f32.xlu0 %v1373_v48  ;;  %v1361_v53 = vsub.f32 %v1344_v31, %v1357_v52 }
 0x2ff   : > { %v1368_v54 = vmul.f32 1.442695, %v1361_v53 }
 0x301   : > { %2173 = vpow2.f32 %v1368_v54 }
 0x303   : > { %v2465_v55 = vpop.eup %2171 }
 0x304   : > { %v1376_v56 = vsel %vm1345_vm3, %v2465_v55, 0.0 }
 0x306   : > { %1013 = vrot.lane.b32.xlu1 %v701_v33, %s2211_s20 }
 0x30b   : > { %v2469_v57 = vpop.eup %2173 }
 0x30c   : > { %v1379_v58 = vsel %vm1345_vm3, %v2469_v57, 0.0 }
 0x313   : > { %1010 = vrot.lane.b32.xlu0 %v701_v33, %s2213_s26 }
 0x32a   : > { %1377 = vadd.xlane.f32.xlu1 %v1376_v56 }
 0x332   : > { %1380 = vadd.xlane.f32.xlu0 %v1379_v58 }
 0x382   : > { %v1372_v60 = vpop.xlane.xlu1 %1371 }
 0x383   : > { %2175 = vrcp.f32 %v1372_v60 }
 0x386   : > { %v1014_v61 = vpop.permute.xlu1 %1013 }
 0x387   : > { %v1032_v63 = vcombine.low %v1008_v59, %v1014_v61  ;;  %v1033_v0 = vcombine.high %v1008_v59, %v1014_v61 }
 0x389   : > { %v1040_v5 = vrot.slane %v1032_v63, %v2391_v39  ;;  %v1047_v6 = vrot.slane %v1033_v0, %v2391_v39  ;;  %v2163_v0 = vld [vmem:[%s2577_s8] sm:$0xff]  }
 0x38a   : > { %v1375_v62 = vpop.xlane.xlu0 %1374 }
 0x38b   : > { %2177 = vrcp.f32 %v1375_v62 }
 0x38d   : > { %v2176_v30 = vpop.eup %2175 }
 0x38e   : > { %v1011_v2 = vpop.permute.xlu0 %1010  ;;  %v1386_v41 = vmul.f32 %v2176_v30, %v2455_v44  ;;  %v2165_v30 = vld [vmem:[%s2577_s8 + $0x10] sm:$0xff]  }
 0x38f   : > { %v1016_v3 = vcombine.low %v701_v33, %v1011_v2  ;;  %v1017_v4 = vcombine.high %v701_v33, %v1011_v2 }
 0x390   : > { %v1390_v52 = vpack.c.bf16 %v1386_v41, %v1386_v41 }
 0x391   : > { %v1024_v7 = vrot.slane %v1016_v3, %v2391_v39  ;;  %v1031_v8 = vrot.slane %v1017_v4, %v2391_v39 }
 0x393   : > { %v1048_v9 = vcombine.low %v1024_v7, %v1040_v5  ;;  %v1049_v11 = vcombine.high %v1024_v7, %v1040_v5  ;;  %v1064_v12 = vcombine.low %v1031_v8, %v1047_v6  ;;  %v1065_v13 = vcombine.high %v1031_v8, %v1047_v6 }
 0x395   : > { %v1056_v14 = vrot.slane %v1048_v9, %v2393_v46  ;;  %v1063_v15 = vrot.slane %v1049_v11, %v2393_v46  ;;  %v1072_v16 = vrot.slane %v1064_v12, %v2393_v46  ;;  %v1079_v17 = vrot.slane %v1065_v13, %v2393_v46  ;;  %v2178_v35 = vpop.eup %2177 }
 0x396   : > { %v1387_v42 = vmul.f32 %v2178_v35, %v2459_v47 }
 0x397   : > { %v1084_v18 = vcombine.low %v1056_v14, %v1063_v15  ;;  %v1963_v19 = vcombine.high %v1056_v14, %v1063_v15  ;;  %v1100_v20 = vcombine.low %v1072_v16, %v1079_v17  ;;  %v1964_v21 = vcombine.high %v1072_v16, %v1079_v17 }
 0x398   : > { %v1391_v53 = vpack.c.bf16 %v1387_v42, %v1387_v42 }
 0x399   : > { %v1091_v22 = vrot.slane %v1084_v18, %v2391_v39  ;;  %v1099_v23 = vrot.slane %v1963_v19, %v2391_v39  ;;  %v1107_v24 = vrot.slane %v1100_v20, %v2391_v39  ;;  %v1115_v25 = vrot.slane %v1964_v21, %v2391_v39 }
 0x39b   : > { %v1116_v26 = vcombine.low %v1091_v22, %v1099_v23  ;;  %v1132_v27 = vcombine.low %v1107_v24, %v1115_v25  ;;  %v1117_v28 = vcombine.high %v1091_v22, %v1099_v23  ;;  %v1133_v29 = vcombine.high %v1107_v24, %v1115_v25 }
 0x39d   : > { %v1124_v31 = vrot.slane %v1116_v26, %v2393_v46  ;;  %v1140_v32 = vrot.slane %v1132_v27, %v2393_v46  ;;  %v1131_v33 = vrot.slane %v1117_v28, %v2393_v46  ;;  %v1147_v34 = vrot.slane %v1133_v29, %v2393_v46 }
 0x39f   : > { %v1148_v36 = vcombine.low %v1124_v31, %v1140_v32  ;;  %v1149_v37 = vcombine.high %v1124_v31, %v1140_v32  ;;  %v1150_v38 = vcombine.low %v1131_v33, %v1147_v34  ;;  %v1151_v40 = vcombine.high %v1131_v33, %v1147_v34 }
 0x3a1   : > { %v1152_v43 = vpack.c.bf16 %v1148_v36, %v1148_v36  ;;  %v1153_v45 = vpack.c.bf16 %v1149_v37, %v1149_v37  ;;  %v1154_v50 = vpack.c.bf16 %v1150_v38, %v1150_v38  ;;  %v1155_v51 = vpack.c.bf16 %v1151_v40, %v1151_v40  ;;  %v2166_v40 = vld [vmem:[%s2577_s8 + $0x18] sm:$0xff]  }
 0x3a3   : > { %v1399_v48 = vsel %vm1397_vm4, %v1152_v43, 0  ;;  %v1445_v49 = vsel %vm1397_vm4, %v1153_v45, 0  ;;  %v1491_v44 = vsel %vm1397_vm4, %v1154_v50, 0  ;;  %v1537_v47 = vsel %vm1397_vm4, %v1155_v51, 0 }
 0x3a4   : > { %2082 = vmatpush3.bf16.msra.mxu0 %v1399_v48  ;;  %2088 = vmatpush3.bf16.msra.mxu1 %v1445_v49 }
 0x3a5   : > { %2093 = vmatprep.subr.bf16.mxu0 %v2209_v1  ;;  %2099 = vmatprep.subr.bf16.mxu1 %v2209_v1 }
 0x3a7   : > { %2084 = vmatmul.mubr.msk.bf16.vlgmr.msra.gmra.mrb[8].mxu0 %vm1345_vm3, %v1390_v52  ;;  %2090 = vmatmul.mubr.msk.bf16.vlgmr.msra.gmra.mrb[20].mxu1 %vm1345_vm3, %v1391_v53 }
 0x3a8   : > { %2094 = vmatpush3.bf16.msra.mxu0 %v1491_v44  ;;  %2100 = vmatpush3.bf16.msra.mxu1 %v1537_v47 }
 0x3a9   : > { %2095 = vmatprep.mubr.msk.bf16.mxu0 %vm2210_vm0, %v2209_v1  ;;  %2101 = vmatprep.mubr.msk.bf16.mxu1 %vm2210_vm0, %v2209_v1 }
 0x3aa   : > { %2105 = vmatprep.subr.bf16.mxu0 %v2209_v1 }
 0x3b7   : > { %v1378_v54 = vpop.xlane.xlu1 %1377 }
 0x3b8   : > { %2179 = vrcp.f32 %v1378_v54 }
 0x3bf   : > { %v1381_v56 = vpop.xlane.xlu0 %1380 }
 0x3c0   : > { %2181 = vrcp.f32 %v1381_v56 }
 0x3c2   : > { %v2180_v58 = vpop.eup %2179 }
 0x3c3   : > { %v1388_v59 = vmul.f32 %v2180_v58, %v2465_v55  ;;  %v2164_v55 = vld [vmem:[%s2577_s8 + $0x8] sm:$0xff]  }
 0x3c5   : > { %v1392_v60 = vpack.c.bf16 %v1388_v59, %v1388_v59 }
 0x3c7   : > { %2096 = vmatmul.mubr.msk.bf16.vlgmr.msra.gmra.mrb[12].mxu0 %vm1345_vm3, %v1392_v60 }
 0x3c8   : > { %2113 = vmatprep.mubr.msk.bf16.mxu0 %vm2210_vm0, %v2209_v1  ;;  %2106 = vmatpush3.bf16.msra.mxu0 %v2163_v0  ;;  %v1975_v0 = vld [vmem:[%s2578_s9] ss:$0 sm:$0xff] }
 0x3c9   : > { %2107 = vmatprep.subr.bf16.mxu0 %v2209_v1 }
 0x3ca   : > { %v2182_v61 = vpop.eup %2181 }
 0x3cb   : > { %v1389_v62 = vmul.f32 %v2182_v61, %v2469_v57 }
 0x3cc   : > { %2108 = vmatpush3.bf16.msra.mxu0 %v2164_v55 }
 0x3cd   : > { %v1393_v63 = vpack.c.bf16 %v1389_v62, %v1389_v62  ;;  %2109 = vmatprep.subr.bf16.mxu0 %v2209_v1 }
 0x3cf   : > { %2102 = vmatmul.mubr.msk.bf16.vlgmr.msra.gmra.mrb[24].mxu1 %vm1345_vm3, %v1393_v63 }
 0x3d0   : > { %2110 = vmatpush3.bf16.msra.mxu0 %v2165_v30 }
 0x3d1   : > { %2111 = vmatprep.subr.bf16.mxu0 %v2209_v1 }
 0x3d4   : > { %2112 = vmatpush3.bf16.msra.mxu0 %v2166_v40 }
 0x47a   : > { %v1435_v2 = vpop.f32.mrb[8].mxu0  ;;  %v1481_v3 = vpop.f32.mrb[20].mxu1 }
 0x47b   : > { %v2085_v57 = vpop.f32.mrb[9].mxu0  ;;  %v2091_v4 = vpop.f32.mrb[21].mxu1 }
 0x47c   : > { %v1438_v5 = vpop.f32.mrb[10].mxu0  ;;  %v1484_v6 = vpop.f32.mrb[22].mxu1 }
 0x47d   : > { %v2086_v7 = vpop.f32.mrb[11].mxu0  ;;  %v2092_v8 = vpop.f32.mrb[23].mxu1 }
 0x49a   : > { %v1527_v9 = vpop.f32.mrb[12].mxu0 }
 0x49b   : > { %v1579_v11 = vcombine.low %v1435_v2, %v1527_v9  ;;  %v1580_v12 = vcombine.high %v1435_v2, %v1527_v9  ;;  %v2097_v13 = vpop.f32.mrb[13].mxu0 }
 0x49c   : > { %v1530_v14 = vpop.f32.mrb[14].mxu0 }
 0x49d   : > { %v2098_v15 = vpop.f32.mrb[15].mxu0  ;;  %v1587_v21 = vrot.slane %v1579_v11, %v2391_v39  ;;  %v1594_v22 = vrot.slane %v1580_v12, %v2391_v39 }
 0x4a2   : > { %v1573_v16 = vpop.f32.mrb[24].mxu1 }
 0x4a3   : > { %v1595_v17 = vcombine.low %v1481_v3, %v1573_v16  ;;  %v1596_v18 = vcombine.high %v1481_v3, %v1573_v16  ;;  %v2103_v19 = vpop.f32.mrb[25].mxu1 }
 0x4a4   : > { %v1576_v20 = vpop.f32.mrb[26].mxu1 }
 0x4a5   : > { %v1603_v23 = vrot.slane %v1595_v17, %v2391_v39  ;;  %v1610_v24 = vrot.slane %v1596_v18, %v2391_v39  ;;  %v2104_v25 = vpop.f32.mrb[27].mxu1  ;;  %v1982_v18 = vld [vmem:[%s2580_s11] ss:$0 sm:$0xff] }
 0x4a7   : > { %v1611_v26 = vcombine.low %v1587_v21, %v1603_v23  ;;  %v1612_v27 = vcombine.high %v1587_v21, %v1603_v23  ;;  %v1627_v28 = vcombine.low %v1594_v22, %v1610_v24  ;;  %v1628_v29 = vcombine.high %v1594_v22, %v1610_v24 }
 0x4a9   : > { %v1619_v31 = vrot.slane %v1611_v26, %v2393_v46  ;;  %v1626_v32 = vrot.slane %v1612_v27, %v2393_v46  ;;  %v1635_v33 = vrot.slane %v1627_v28, %v2393_v46  ;;  %v1642_v34 = vrot.slane %v1628_v29, %v2393_v46 }
 0x4ab   : > { %v1647_v35 = vcombine.low %v1619_v31, %v1626_v32  ;;  %v1973_v36 = vcombine.high %v1619_v31, %v1626_v32  ;;  %v1663_v37 = vcombine.low %v1635_v33, %v1642_v34  ;;  %v1974_v38 = vcombine.high %v1635_v33, %v1642_v34 }
 0x4ad   : > { %v1654_v41 = vrot.slane %v1647_v35, %v2391_v39  ;;  %v1662_v42 = vrot.slane %v1973_v36, %v2391_v39  ;;  %v1670_v43 = vrot.slane %v1663_v37, %v2391_v39  ;;  %v1678_v45 = vrot.slane %v1974_v38, %v2391_v39 }
 0x4af   : > { %v1680_v48 = vcombine.high %v1654_v41, %v1662_v42  ;;  %v1696_v49 = vcombine.high %v1670_v43, %v1678_v45  ;;  %v1679_v1 = vcombine.low %v1654_v41, %v1662_v42  ;;  %v1695_v50 = vcombine.low %v1670_v43, %v1678_v45 }
 0x4b1   : > { %v1694_v51 = vrot.slane %v1680_v48, %v2393_v46  ;;  %v1710_v52 = vrot.slane %v1696_v49, %v2393_v46  ;;  %v1687_v53 = vrot.slane %v1679_v1, %v2393_v46  ;;  %v1703_v44 = vrot.slane %v1695_v50, %v2393_v46 }
 0x4b3   : > { %v1713_v47 = vcombine.low %v1694_v51, %v1710_v52  ;;  %v1712_v54 = vcombine.high %v1687_v53, %v1703_v44  ;;  %v1714_v56 = vcombine.high %v1694_v51, %v1710_v52  ;;  %v1711_v58 = vcombine.low %v1687_v53, %v1703_v44 }
 0x4b5   : > { %1720 = vrot.lane.b32.xlu1 %v1713_v47, %s2216_s30  ;;  %1716 = vrot.lane.b32.xlu0 %v1712_v54, %s2217_s13 }
 0x4b9   : > { %1724 = vrot.lane.b32.xlu1 %v1714_v56, %s2218_s14 }
 0x527   : > { %v1721_v39 = vpop.permute.xlu1 %1720  ;;  %v1717_v59 = vpop.permute.xlu0 %1716 }
 0x528   : > { %v1727_v60 = vsel %vm1156_vm2, %v1711_v58, %v1717_v59 }
 0x529   : > { %v1729_v62 = vsel %vm1728_vm5, %v1727_v60, %v1721_v39 }
 0x52b   : > { %v1725_v61 = vpop.permute.xlu1 %1724 }
 0x52c   : > { %v1731_v63 = vsel %vm1730_vm6, %v1729_v62, %v1725_v61 }
 0x52d   : > { %v1732_v46 = vpack.c.bf16 %v1731_v63, %v1731_v63 }
 0x52f   : > { %2114 = vmatmul.mubr.msk.bf16.vlgmr.msra.gmra.mrb[16].mxu0 %vm501_vm1, %v1732_v46 }
 0x602   : > { %v1809_v55 = vpop.f32.mrb[16].mxu0 }
 0x603   : > { %v1810_v2 = vadd.f32 %v1975_v0, %v1809_v55  ;;  %v2115_v3 = vpop.f32.mrb[17].mxu0 }
 0x604   : > { %v1812_v57 = vpop.f32.mrb[18].mxu0 }
 0x605   : > { %v2116_v4 = vpop.f32.mrb[19].mxu0  ;;  %v1817_v5 = vadd.f32 %v1810_v2, %v2346_v10  ;;  %v1981_v10 = vld [vmem:[%s2579_s10] ss:$0 sm:$0xff] }
 0x607   : > { %v1818_v6 = vsel %vm501_vm1, %v1817_v5, 0.0 }
 0x608   : > { %1819 = vadd.xlane.f32.xlu0 %v1818_v6 }
 0x695   : > { %v1820_v7 = vpop.xlane.xlu0 %1819 }
 0x696   : > { %v1822_v8 = vmul.f32 0.015625, %v1820_v7 }
 0x698   : > { %v1823_v9 = vsub.f32 %v1817_v5, %v1822_v8 }
 0x69a   : > { %v1824_v11 = vmul.f32 %v1823_v9, %v1823_v9 }
 0x69c   : > { %v1825_v12 = vsel %vm501_vm1, %v1824_v11, 0.0 }
 0x69d   : > { %1826 = vadd.xlane.f32.xlu1 %v1825_v12 }
 0x72a   : > { %v1827_v13 = vpop.xlane.xlu1 %1826 }
 0x72b   : > { %v1828_v14 = vmul.f32 0.015625, %v1827_v13 }
 0x72d   : > { %v1829_v15 = vadd.f32 1e-05, %v1828_v14 }
 0x72f   : > { %2183 = vrsqrt.f32 %v1829_v15 }
 0x739   : > { %v2184_v16 = vpop.eup %2183 }
 0x73a   : > { %v1831_v17 = vmul.f32 %v2184_v16, %v1823_v9 }
 0x73c   : > { %v1838_v19 = vmul.f32 %v1981_v10, %v1831_v17 }
 0x73e   : > { %v1845_v20 = vadd.f32 %v1982_v18, %v1838_v19 }
 0x740   : > { %1846 = vst.msk [vmem:[%s456_s28] sm:$0xff] %vm501_vm1, %v1845_v20 }
 0x741 PF: > { %s22_s23 = sadd.s32 1, %s2207_s23   ;;  %s2582_s21 = smov %s2203_s22 }
 0x742   : > { %p19_p5 = scmp.ge.s32.totalorder %s22_s23, 4   ;;  %s2583_s22 = smov %s2585_s24 }
 0x744   :  { %21 = sbr.rel (!%p19_p5) target bundleno = 2 (0x2), region = 101 }

// kernel: _lambda_.15
= control target key start
LH: loop header
LB: loop body
LE: loop exit
PB: predicated region body
PF: predicated region fallthrough
CT: control target
= control target key end

     0   :  { %s2299_s21 = smov 0   ;;  %s2301_s22 = smov 0   ;;  %s2591_s0 = inlined_call_operand.vmem [shape: f32[2,8,64], index: 0, kind: input, shape index: {}, may-alias: {0,1}]   ;;  %s2592_s1 = inlined_call_operand.vmem [shape: f32[2,8,64], index: 1, kind: input, shape index: {}, may-alias: {0,1}]   ;;  %s2593_s2 = inlined_call_operand.vmem [shape: bf16[64,64], index: 2, kind: input, shape index: {}]   ;;  %s2594_s3 = inlined_call_operand.vmem [shape: f32[1,64], index: 3, kind: input, shape index: {}]   ;;  %s2595_s4 = inlined_call_operand.vmem [shape: bf16[64,64], index: 4, kind: input, shape index: {}]   ;;  %s2596_s5 = inlined_call_operand.vmem [shape: f32[1,64], index: 5, kind: input, shape index: {}]   ;;  %s2597_s6 = inlined_call_operand.vmem [shape: bf16[64,64], index: 6, kind: input, shape index: {}]   ;;  %s2598_s7 = inlined_call_operand.vmem [shape: f32[1,64], index: 7, kind: input, shape index: {}]   ;;  %s2599_s8 = inlined_call_operand.vmem [shape: bf16[64,64], index: 8, kind: input, shape index: {}]   ;;  %s2600_s9 = inlined_call_operand.vmem [shape: f32[1,64], index: 9, kind: input, shape index: {}]   ;;  %s2601_s10 = inlined_call_operand.vmem [shape: f32[1,64], index: 10, kind: input, shape index: {}]   ;;  %s2602_s11 = inlined_call_operand.vmem [shape: f32[1,64], index: 11, kind: input, shape index: {}]   ;;  %s2603_s12 = inlined_call_operand.vmem [shape: f32[2,8,64], index: 12, kind: output, shape index: {}]  }
   0x1   :  { %s2303_s23 = smov 0  }
   0x2 LB: > { %s34_s24 = sadd.s32 1, %s2217_s22  ;;  %p1950_p0 = scmp.ge.s32.totalorder %s2221_s23, 1  ;;  %s2221_s23 = sphi %s2303_s23, %s22_s23   ;;  %s2217_s22 = sphi %s2301_s22, %s2605_s22   ;;  %s2213_s21 = sphi %s2299_s21, %s2604_s21  }
   0x3   : > { %p36_p1 = scmp.ge.s32.totalorder %s34_s24, 2  ;;  %p389_p2 = scmp.lt.s32.totalorder %s2221_s23, 3 }
   0x5   : > { %s2607_s24 = smov (%p36_p1, %s34_s24), 0  ;;  %p390_p3 = pnand %p1950_p0, %p389_p2 }
   0x6   : > { %v2165_v0 = vld [vmem:[%s2595_s4] sm:$0xff] (!%p390_p3)   ;;  %v2223_v1 = vmov (!%p390_p3), 0.0   ;;  %v2167_v3 = vld [vmem:[%s2595_s4 + $0x8] sm:$0xff] (!%p390_p3)   ;;  %vm2224_vm0 = vmmov (!%p390_p3), 0   ;;  %p439_p4 = scmp.lt.s32.totalorder (!%p390_p3), %s2213_s21, 1  ;;  %v2169_v5 = vld [vmem:[%s2595_s4 + $0x10] sm:$0xff] (!%p390_p3)   ;;  %v721_v31 = vlaneseq (!%p390_p3) }
   0x7   : > { %393 = sbr.rel (%p390_p3) target bundleno = 1859 (0x743), region = 68  ;;  %2046 = vmatprep.subr.bf16.mxu1 (!%p390_p3), %v2223_v1  ;;  %2034 = vmatprep.subr.bf16.mxu0 (!%p390_p3), %v2223_v1  ;;  %v2166_v2 = vld [vmem:[%s2593_s2] sm:$0xff] (!%p390_p3)   ;;  %v2168_v4 = vld [vmem:[%s2593_s2 + $0x8] sm:$0xff] (!%p390_p3)   ;;  %v2170_v6 = vld [vmem:[%s2593_s2 + $0x10] sm:$0xff] (!%p390_p3)   ;;  %vm501_vm1 = vcmask (!%p390_p3), 523264   ;;  %s2225_s20 = smov (!%p390_p3), 80  }
   0x8   : > { %2047 = vmatpush3.bf16.msra.mxu1 (!%p390_p3), %v2165_v0  ;;  %2054 = vmatprep.mubr.msk.bf16.mxu1 (!%p390_p3), %vm2224_vm0, %v2223_v1  ;;  %v2171_v7 = vld [vmem:[%s2595_s4 + $0x18] sm:$0xff] (!%p390_p3)   ;;  %v1960_v13 = vld [vmem:[%s2596_s5] ss:$0 sm:$0xff] (!%p390_p3)  ;;  %s2226_s25 = smov (!%p390_p3), 112   ;;  %v2174_v26 = vld [vmem:[%s2597_s6 + $0x8] sm:$0xff] (!%p390_p3)   ;;  %v2407_v35 = vshrl.u32 (!%p390_p3), %v721_v31, 7 }
   0x9   : > { %2048 = vmatprep.subr.bf16.mxu1 (!%p390_p3), %v2223_v1  ;;  %2035 = vmatpush3.bf16.msra.mxu0 (!%p390_p3), %v2166_v2  ;;  %v2172_v9 = vld [vmem:[%s2593_s2 + $0x18] sm:$0xff] (!%p390_p3)   ;;  %v1954_v15 = vld [vmem:[%s2594_s3] ss:$0 sm:$0xff] (!%p390_p3)  ;;  %v2175_v27 = vld [vmem:[%s2597_s6 + $0x10] sm:$0xff] (!%p390_p3)   ;;  %v2228_v29 = vmov (!%p390_p3), 1983009808  }
   0xa   : > { %2036 = vmatprep.subr.bf16.mxu0 (!%p390_p3), %v2223_v1  ;;  %2042 = vmatprep.mubr.msk.bf16.mxu0 (!%p390_p3), %vm2224_vm0, %v2223_v1  ;;  %v2173_v25 = vld [vmem:[%s2597_s6] sm:$0xff] (!%p390_p3)   ;;  %v2176_v28 = vld [vmem:[%s2597_s6 + $0x18] sm:$0xff] (!%p390_p3)   ;;  %v719_v30 = vunpack.c.l.s4 (!%p390_p3), %v2228_v29  ;;  %v2229_v32 = vmov (!%p390_p3), 1934713408   ;;  %vm1156_vm2 = vcmask (!%p390_p3), 130048   ;;  %vm1358_vm4 = vcmask (!%p390_p3), 64512  }
   0xb   : > { %v751_v33 = vunpack.c.l.s4 (!%p390_p3), %v2229_v32  ;;  %vm1410_vm5 = vcmask (!%p390_p3), 1043456   ;;  %s2232_s13 = smov (!%p390_p3), 16   ;;  %s2233_s14 = smov (!%p390_p3), 48   ;;  %vm1741_vm6 = vcmask (!%p390_p3), 261120   ;;  %vm1743_vm7 = vcmask (!%p390_p3), 392192  }
   0xc   : > { %2049 = vmatpush3.bf16.msra.mxu1 (!%p390_p3), %v2167_v3  ;;  %v720_v34 = vunpack.c.0.s8 (!%p390_p3), %v719_v30 }
   0xd   : > { %2050 = vmatprep.subr.bf16.mxu1 (!%p390_p3), %v2223_v1  ;;  %2037 = vmatpush3.bf16.msra.mxu0 (!%p390_p3), %v2168_v4  ;;  %v752_v38 = vunpack.c.0.s8 (!%p390_p3), %v751_v33 }
   0xe   : > { %s2609_s21 = smov (!%p439_p4, %s2213_s21), 1  ;;  %2038 = vmatprep.subr.bf16.mxu0 %v2223_v1  ;;  %v2410_v39 = vsub.s32 %v720_v34, %v2407_v35 }
   0xf   : > { %s2340_s17 = sshll.u32 %s2609_s21, 3  ;;  %v2413_v46 = vsub.s32 %v752_v38, %v2407_v35 }
  0x10   : > { %s449_s26 = scalar_lea.vmem %s2592_s1, %s2340_s17  ;;  %s445_s30 = scalar_lea.vmem %s2591_s0, %s2340_s17  ;;  %2051 = vmatpush3.bf16.msra.mxu1 %v2169_v5 }
  0x11   : > { %v459_v8 = vld [vmem:[%s449_s26] sm:$0xff]  ;;  %2052 = vmatprep.subr.bf16.mxu1 %v2223_v1  ;;  %2039 = vmatpush3.bf16.msra.mxu0 %v2170_v6  ;;  %s2227_s26 = smov 96   ;;  %s456_s28 = scalar_lea.vmem %s2603_s12, %s2340_s17 }
  0x12   : > { %v2361_v10 = vld [vmem:[%s445_s30] sm:$0xff]  ;;  %2040 = vmatprep.subr.bf16.mxu0 %v2223_v1  ;;  %v461_v11 = vpack.c.bf16 %v459_v8, %v459_v8  ;;  %s2231_s30 = smov 32  }
  0x13   : > { %v460_v12 = vpack.c.bf16 %v2361_v10, %v2361_v10 }
  0x14   : > { %2053 = vmatpush3.bf16.msra.mxu1 %v2171_v7 }
  0x15   : > { %2041 = vmatpush3.bf16.msra.mxu0 %v2172_v9  ;;  %2070 = vmatprep.subr.bf16.mxu1 %v2223_v1 }
  0x16   : > { %2058 = vmatprep.subr.bf16.mxu0 %v2223_v1 }
  0x17   : > { %2055 = vmatmul.mubr.msk.bf16.vlgmr.msra.gmra.mrb[0].mxu1 %vm501_vm1, %v461_v11 }
  0x18   : > { %2043 = vmatmul.mubr.msk.bf16.vlgmr.msra.gmra.mrb[0].mxu0 %vm501_vm1, %v460_v12  ;;  %2072 = vmatprep.mubr.msk.bf16.mxu1 %vm2224_vm0, %v2223_v1 }
  0x19   : > { %2066 = vmatprep.mubr.msk.bf16.mxu0 %vm2224_vm0, %v2223_v1  ;;  %2059 = vmatpush3.bf16.msra.mxu0 %v2173_v25 }
  0x1a   : > { %2060 = vmatprep.subr.bf16.mxu0 %v2223_v1 }
  0x1d   : > { %2061 = vmatpush3.bf16.msra.mxu0 %v2174_v26 }
  0x1e   : > { %2062 = vmatprep.subr.bf16.mxu0 %v2223_v1 }
  0x21   : > { %2063 = vmatpush3.bf16.msra.mxu0 %v2175_v27 }
  0x22   : > { %2064 = vmatprep.subr.bf16.mxu0 %v2223_v1 }
  0x25   : > { %2065 = vmatpush3.bf16.msra.mxu0 %v2176_v28 }
  0x26   : > { %2094 = vmatprep.subr.bf16.mxu0 %v2223_v1 }
  0x28   : > { %2067 = vmatmul.mubr.msk.bf16.vlgmr.msra.gmra.mrb[4].mxu0 %vm501_vm1, %v461_v11 }
  0x29   : > { %2096 = vmatprep.mubr.msk.bf16.mxu0 %vm2224_vm0, %v2223_v1 }
  0xea   : > { %v621_v14 = vpop.f32.mrb[0].mxu1 }
  0xeb   : > { %v622_v16 = vadd.f32 %v1960_v13, %v621_v14  ;;  %v2056_v17 = vpop.f32.mrb[1].mxu1  ;;  %v539_v18 = vpop.f32.mrb[0].mxu0 }
  0xec   : > { %v624_v19 = vpop.f32.mrb[2].mxu1  ;;  %v2044_v20 = vpop.f32.mrb[1].mxu0  ;;  %v540_v22 = vadd.f32 %v1954_v15, %v539_v18 }
  0xed   : > { %863 = vrot.lane.b32.xlu1 %v622_v16, %s2225_s20  ;;  %857 = vrot.lane.b32.xlu0 %v622_v16, %s2226_s25  ;;  %v2057_v21 = vpop.f32.mrb[3].mxu1  ;;  %v542_v23 = vpop.f32.mrb[2].mxu0 }
  0xee   : > { %v2045_v24 = vpop.f32.mrb[3].mxu0 }
  0xf1   : > { %860 = vrot.lane.b32.xlu0 %v622_v16, %s2227_s26  ;;  %707 = vrot.lane.b32.xlu1 %v540_v22, %s2226_s25 }
  0xf5   : > { %710 = vrot.lane.b32.xlu0 %v540_v22, %s2227_s26  ;;  %713 = vrot.lane.b32.xlu1 %v540_v22, %s2225_s20 }
 0x15f   : > { %v864_v36 = vpop.permute.xlu1 %863  ;;  %v858_v37 = vpop.permute.xlu0 %857 }
 0x160   : > { %v882_v40 = vcombine.low %v858_v37, %v864_v36  ;;  %v883_v41 = vcombine.high %v858_v37, %v864_v36 }
 0x162   : > { %v890_v47 = vrot.slane %v882_v40, %v2410_v39  ;;  %v897_v48 = vrot.slane %v883_v41, %v2410_v39 }
 0x163   : > { %v861_v42 = vpop.permute.xlu0 %860  ;;  %v708_v43 = vpop.permute.xlu1 %707 }
 0x164   : > { %v866_v44 = vcombine.low %v622_v16, %v861_v42  ;;  %v867_v45 = vcombine.high %v622_v16, %v861_v42 }
 0x166   : > { %v874_v49 = vrot.slane %v866_v44, %v2410_v39  ;;  %v881_v50 = vrot.slane %v867_v45, %v2410_v39 }
 0x167   : > { %v711_v51 = vpop.permute.xlu0 %710  ;;  %v714_v52 = vpop.permute.xlu1 %713 }
 0x168   : > { %v898_v53 = vcombine.low %v874_v49, %v890_v47  ;;  %v899_v54 = vcombine.high %v874_v49, %v890_v47  ;;  %v914_v55 = vcombine.low %v881_v50, %v897_v48  ;;  %v915_v56 = vcombine.high %v881_v50, %v897_v48 }
 0x169   : > { %v716_v57 = vcombine.low %v540_v22, %v711_v51  ;;  %v717_v58 = vcombine.high %v540_v22, %v711_v51  ;;  %v732_v59 = vcombine.low %v708_v43, %v714_v52  ;;  %v733_v60 = vcombine.high %v708_v43, %v714_v52 }
 0x16a   : > { %v906_v61 = vrot.slane %v898_v53, %v2413_v46  ;;  %v913_v62 = vrot.slane %v899_v54, %v2413_v46  ;;  %v922_v63 = vrot.slane %v914_v55, %v2413_v46  ;;  %v929_v0 = vrot.slane %v915_v56, %v2413_v46 }
 0x16b   : > { %v724_v2 = vrot.slane %v716_v57, %v2410_v39  ;;  %v731_v3 = vrot.slane %v717_v58, %v2410_v39  ;;  %v740_v4 = vrot.slane %v732_v59, %v2410_v39  ;;  %v747_v5 = vrot.slane %v733_v60, %v2410_v39 }
 0x16c   : > { %v934_v6 = vcombine.low %v906_v61, %v913_v62  ;;  %v1974_v7 = vcombine.high %v906_v61, %v913_v62  ;;  %v950_v8 = vcombine.low %v922_v63, %v929_v0  ;;  %v1975_v9 = vcombine.high %v922_v63, %v929_v0 }
 0x16d   : > { %v748_v11 = vcombine.low %v724_v2, %v740_v4  ;;  %v749_v12 = vcombine.high %v724_v2, %v740_v4  ;;  %v764_v13 = vcombine.low %v731_v3, %v747_v5  ;;  %v765_v14 = vcombine.high %v731_v3, %v747_v5 }
 0x16e   : > { %v941_v15 = vrot.slane %v934_v6, %v2410_v39  ;;  %v949_v16 = vrot.slane %v1974_v7, %v2410_v39  ;;  %v957_v17 = vrot.slane %v950_v8, %v2410_v39  ;;  %v965_v18 = vrot.slane %v1975_v9, %v2410_v39  ;;  %v700_v8 = vpop.f32.mrb[4].mxu0 }
 0x16f   : > { %v756_v19 = vrot.slane %v748_v11, %v2413_v46  ;;  %v763_v20 = vrot.slane %v749_v12, %v2413_v46  ;;  %v772_v21 = vrot.slane %v764_v13, %v2413_v46  ;;  %v779_v22 = vrot.slane %v765_v14, %v2413_v46  ;;  %v2068_v9 = vpop.f32.mrb[5].mxu0 }
 0x170   : > { %v966_v23 = vcombine.low %v941_v15, %v949_v16  ;;  %v982_v24 = vcombine.low %v957_v17, %v965_v18  ;;  %v967_v47 = vcombine.high %v941_v15, %v949_v16  ;;  %v983_v48 = vcombine.high %v957_v17, %v965_v18  ;;  %v703_v11 = vpop.f32.mrb[6].mxu0 }
 0x171   : > { %v784_v25 = vcombine.low %v756_v19, %v763_v20  ;;  %v1972_v26 = vcombine.high %v756_v19, %v763_v20  ;;  %v800_v27 = vcombine.low %v772_v21, %v779_v22  ;;  %v1973_v28 = vcombine.high %v772_v21, %v779_v22  ;;  %v2069_v12 = vpop.f32.mrb[7].mxu0 }
 0x172   : > { %v974_v29 = vrot.slane %v966_v23, %v2413_v46  ;;  %v990_v30 = vrot.slane %v982_v24, %v2413_v46  ;;  %v981_v51 = vrot.slane %v967_v47, %v2413_v46  ;;  %v997_v52 = vrot.slane %v983_v48, %v2413_v46 }
 0x173   : > { %v791_v32 = vrot.slane %v784_v25, %v2410_v39  ;;  %v799_v33 = vrot.slane %v1972_v26, %v2410_v39  ;;  %v807_v34 = vrot.slane %v800_v27, %v2410_v39  ;;  %v815_v36 = vrot.slane %v1973_v28, %v2410_v39 }
 0x174   : > { %v998_v37 = vcombine.low %v974_v29, %v990_v30  ;;  %v999_v45 = vcombine.high %v974_v29, %v990_v30  ;;  %v1000_v55 = vcombine.low %v981_v51, %v997_v52  ;;  %v1001_v0 = vcombine.high %v981_v51, %v997_v52 }
 0x175   : > { %v816_v38 = vcombine.low %v791_v32, %v799_v33  ;;  %v832_v40 = vcombine.low %v807_v34, %v815_v36  ;;  %v817_v56 = vcombine.high %v791_v32, %v799_v33  ;;  %v833_v57 = vcombine.high %v807_v34, %v815_v36 }
 0x176   : > { %v1002_v41 = vpack.c.bf16 %v998_v37, %v998_v37  ;;  %v1003_v50 = vpack.c.bf16 %v999_v45, %v999_v45  ;;  %v1004_v59 = vpack.c.bf16 %v1000_v55, %v1000_v55  ;;  %v1005_v3 = vpack.c.bf16 %v1001_v0, %v1001_v0 }
 0x177   : > { %v824_v42 = vrot.slane %v816_v38, %v2413_v46  ;;  %v840_v43 = vrot.slane %v832_v40, %v2413_v46  ;;  %v831_v61 = vrot.slane %v817_v56, %v2413_v46  ;;  %v847_v62 = vrot.slane %v833_v57, %v2413_v46  ;;  %v1966_v38 = vld [vmem:[%s2598_s7] ss:$0 sm:$0xff] }
 0x178   : > { %v1161_v44 = vsel %vm1156_vm2, %v1002_v41, 0  ;;  %v1207_v54 = vsel %vm1156_vm2, %v1003_v50, 0  ;;  %v1253_v63 = vsel %vm1156_vm2, %v1004_v59, 0  ;;  %v1299_v5 = vsel %vm1156_vm2, %v1005_v3, 0 }
 0x179   : > { %2071 = vmatpush3.bf16.xpose.msra.mxu1 %v1161_v44  ;;  %v848_v49 = vcombine.low %v824_v42, %v840_v43  ;;  %v849_v58 = vcombine.high %v824_v42, %v840_v43  ;;  %v850_v2 = vcombine.low %v831_v61, %v847_v62  ;;  %v851_v6 = vcombine.high %v831_v61, %v847_v62 }
 0x17a   : > { %2076 = vmatprep.subr.bf16.mxu1 %v2223_v1  ;;  %v1351_v13 = vand.u32 127, %v721_v31  ;;  %v2230_v15 = vmov -1e+09   ;;  %v701_v45 = vadd.f32 %v1966_v38, %v700_v8 }
 0x17b   : > { %v852_v53 = vpack.c.bf16 %v848_v49, %v848_v49  ;;  %v853_v60 = vpack.c.bf16 %v849_v58, %v849_v58  ;;  %v854_v4 = vpack.c.bf16 %v850_v2, %v850_v2  ;;  %v855_v7 = vpack.c.bf16 %v851_v6, %v851_v6 }
 0x17c   : > { %vm1352_vm3 = vcmp.le.s32.totalorder %v1351_v13, %v2407_v35 }
 0x17d   : > { %v1353_v16 = vsel %vm1352_vm3, 0.0, %v2230_v15 }
 0x180   : > { %2073 = vmatmul.mubr.msk.bf16.vlgmr.msra.gmra.mrb[4].mxu1 %vm1156_vm2, %v852_v53 }
 0x181   : > { %2077 = vmatpush3.bf16.xpose.msra.mxu1 %v1207_v54  ;;  %2078 = vmatprep.mubr.msk.bf16.mxu1 %vm2224_vm0, %v2223_v1 }
 0x182   : > { %2082 = vmatprep.subr.bf16.mxu1 %v2223_v1 }
 0x188   : > { %2079 = vmatmul.mubr.msk.bf16.vlgmr.msra.gmra.mrb[8].mxu1 %vm1156_vm2, %v853_v60 }
 0x189   : > { %2083 = vmatpush3.bf16.xpose.msra.mxu1 %v1253_v63  ;;  %2084 = vmatprep.mubr.msk.bf16.mxu1 %vm2224_vm0, %v2223_v1 }
 0x18a   : > { %2088 = vmatprep.subr.bf16.mxu1 %v2223_v1 }
 0x190   : > { %2085 = vmatmul.mubr.msk.bf16.vlgmr.msra.gmra.mrb[12].mxu1 %vm1156_vm2, %v854_v4 }
 0x191   : > { %2089 = vmatpush3.bf16.xpose.msra.mxu1 %v1299_v5  ;;  %2090 = vmatprep.mubr.msk.bf16.mxu1 %vm2224_vm0, %v2223_v1 }
 0x192   : > { %2100 = vmatprep.subr.bf16.mxu1 %v2223_v1 }
 0x198   : > { %2091 = vmatmul.mubr.msk.bf16.vlgmr.msra.gmra.mrb[16].mxu1 %vm1156_vm2, %v855_v7 }
 0x199   : > { %2102 = vmatprep.mubr.msk.bf16.mxu1 %vm2224_vm0, %v2223_v1 }
 0x253   : > { %v1197_v14 = vpop.f32.mrb[4].mxu1 }
 0x254   : > { %v1341_v17 = vmul.f32 0.25, %v1197_v14  ;;  %v2074_v18 = vpop.f32.mrb[5].mxu1 }
 0x255   : > { %v1200_v19 = vpop.f32.mrb[6].mxu1 }
 0x256   : > { %v2075_v20 = vpop.f32.mrb[7].mxu1  ;;  %v1354_v21 = vadd.f32 %v1353_v16, %v1341_v17 }
 0x258   : > { %v1359_v22 = vsel %vm1358_vm4, %v1354_v21, -inf }
 0x259   : > { %1360 = vmax.xlane.f32.xlu0 %v1359_v22 }
 0x25b   : > { %v1243_v23 = vpop.f32.mrb[8].mxu1 }
 0x25c   : > { %v1342_v24 = vmul.f32 0.25, %v1243_v23  ;;  %v2080_v25 = vpop.f32.mrb[9].mxu1 }
 0x25d   : > { %v1246_v26 = vpop.f32.mrb[10].mxu1 }
 0x25e   : > { %v2081_v27 = vpop.f32.mrb[11].mxu1  ;;  %v1355_v31 = vadd.f32 %v1353_v16, %v1342_v24 }
 0x260   : > { %v1362_v35 = vsel %vm1358_vm4, %v1355_v31, -inf }
 0x261   : > { %1363 = vmax.xlane.f32.xlu1 %v1362_v35 }
 0x263   : > { %v1289_v28 = vpop.f32.mrb[12].mxu1 }
 0x264   : > { %v1343_v29 = vmul.f32 0.25, %v1289_v28  ;;  %v2086_v30 = vpop.f32.mrb[13].mxu1 }
 0x265   : > { %v1292_v32 = vpop.f32.mrb[14].mxu1 }
 0x266   : > { %v2087_v33 = vpop.f32.mrb[15].mxu1  ;;  %v1356_v34 = vadd.f32 %v1353_v16, %v1343_v29 }
 0x268   : > { %v1365_v36 = vsel %vm1358_vm4, %v1356_v34, -inf }
 0x269   : > { %1366 = vmax.xlane.f32.xlu0 %v1365_v36 }
 0x26b   : > { %v1335_v37 = vpop.f32.mrb[16].mxu1 }
 0x26c   : > { %v1344_v40 = vmul.f32 0.25, %v1335_v37  ;;  %v2092_v41 = vpop.f32.mrb[17].mxu1 }
 0x26d   : > { %v1338_v42 = vpop.f32.mrb[18].mxu1 }
 0x26e   : > { %v2093_v43 = vpop.f32.mrb[19].mxu1  ;;  %v1357_v44 = vadd.f32 %v1353_v16, %v1344_v40 }
 0x270   : > { %v1368_v47 = vsel %vm1358_vm4, %v1357_v44, -inf }
 0x271   : > { %1369 = vmax.xlane.f32.xlu0 %v1368_v47 }
 0x272   : > { %1007 = vrot.lane.b32.xlu1 %v701_v45, %s2226_s25 }
 0x2e6   : > { %v1361_v48 = vpop.xlane.xlu0 %1360 }
 0x2e7   : > { %v1371_v49 = vsub.f32 %v1354_v21, %v1361_v48 }
 0x2e9   : > { %v1375_v50 = vmul.f32 1.442695, %v1371_v49 }
 0x2eb   : > { %2181 = vpow2.f32 %v1375_v50 }
 0x2ee   : > { %v1364_v51 = vpop.xlane.xlu1 %1363 }
 0x2ef   : > { %v1372_v52 = vsub.f32 %v1355_v31, %v1364_v51 }
 0x2f1   : > { %v1377_v53 = vmul.f32 1.442695, %v1372_v52 }
 0x2f2   : > { %v1008_v5 = vpop.permute.xlu1 %1007 }
 0x2f3   : > { %2183 = vpow2.f32 %v1377_v53 }
 0x2f5   : > { %v2477_v54 = vpop.eup %2181 }
 0x2f6   : > { %v1383_v55 = vsel %vm1358_vm4, %v2477_v54, 0.0  ;;  %v1367_v58 = vpop.xlane.xlu0 %1366 }
 0x2f7   : > { %1384 = vadd.xlane.f32.xlu1 %v1383_v55  ;;  %v1373_v59 = vsub.f32 %v1356_v34, %v1367_v58 }
 0x2f9   : > { %v1379_v60 = vmul.f32 1.442695, %v1373_v59 }
 0x2fb   : > { %2185 = vpow2.f32 %v1379_v60 }
 0x2fd   : > { %v2481_v56 = vpop.eup %2183 }
 0x2fe   : > { %v1386_v57 = vsel %vm1358_vm4, %v2481_v56, 0.0  ;;  %v1370_v61 = vpop.xlane.xlu0 %1369 }
 0x2ff   : > { %1387 = vadd.xlane.f32.xlu0 %v1386_v57  ;;  %v1374_v62 = vsub.f32 %v1357_v44, %v1370_v61 }
 0x301   : > { %v1381_v63 = vmul.f32 1.442695, %v1374_v62 }
 0x303   : > { %2187 = vpow2.f32 %v1381_v63 }
 0x305   : > { %v2487_v0 = vpop.eup %2185 }
 0x306   : > { %v1389_v2 = vsel %vm1358_vm4, %v2487_v0, 0.0 }
 0x308   : > { %1013 = vrot.lane.b32.xlu1 %v701_v45, %s2225_s20 }
 0x30d   : > { %v2491_v3 = vpop.eup %2187 }
 0x30e   : > { %v1392_v4 = vsel %vm1358_vm4, %v2491_v3, 0.0 }
 0x315   : > { %1010 = vrot.lane.b32.xlu0 %v701_v45, %s2227_s26 }
 0x32c   : > { %1390 = vadd.xlane.f32.xlu1 %v1389_v2 }
 0x334   : > { %1393 = vadd.xlane.f32.xlu0 %v1392_v4 }
 0x384   : > { %v1385_v6 = vpop.xlane.xlu1 %1384 }
 0x385   : > { %2189 = vrcp.f32 %v1385_v6 }
 0x388   : > { %v1014_v7 = vpop.permute.xlu1 %1013 }
 0x389   : > { %v1032_v9 = vcombine.low %v1008_v5, %v1014_v7  ;;  %v1033_v11 = vcombine.high %v1008_v5, %v1014_v7 }
 0x38b   : > { %v1040_v15 = vrot.slane %v1032_v9, %v2410_v39  ;;  %v1047_v16 = vrot.slane %v1033_v11, %v2410_v39  ;;  %v2177_v11 = vld [vmem:[%s2599_s8] sm:$0xff]  }
 0x38c   : > { %v1388_v8 = vpop.xlane.xlu0 %1387 }
 0x38d   : > { %2191 = vrcp.f32 %v1388_v8 }
 0x38f   : > { %v2190_v40 = vpop.eup %2189 }
 0x390   : > { %v1011_v12 = vpop.permute.xlu0 %1010  ;;  %v1399_v51 = vmul.f32 %v2190_v40, %v2477_v54  ;;  %v2179_v40 = vld [vmem:[%s2599_s8 + $0x10] sm:$0xff]  }
 0x391   : > { %v1016_v13 = vcombine.low %v701_v45, %v1011_v12  ;;  %v1017_v14 = vcombine.high %v701_v45, %v1011_v12 }
 0x392   : > { %v1403_v61 = vpack.c.bf16 %v1399_v51, %v1399_v51 }
 0x393   : > { %v1024_v17 = vrot.slane %v1016_v13, %v2410_v39  ;;  %v1031_v18 = vrot.slane %v1017_v14, %v2410_v39 }
 0x395   : > { %v1048_v19 = vcombine.low %v1024_v17, %v1040_v15  ;;  %v1049_v20 = vcombine.high %v1024_v17, %v1040_v15  ;;  %v1064_v21 = vcombine.low %v1031_v18, %v1047_v16  ;;  %v1065_v22 = vcombine.high %v1031_v18, %v1047_v16 }
 0x397   : > { %v1056_v23 = vrot.slane %v1048_v19, %v2413_v46  ;;  %v1063_v24 = vrot.slane %v1049_v20, %v2413_v46  ;;  %v1072_v25 = vrot.slane %v1064_v21, %v2413_v46  ;;  %v1079_v26 = vrot.slane %v1065_v22, %v2413_v46  ;;  %v2192_v45 = vpop.eup %2191 }
 0x398   : > { %v1400_v52 = vmul.f32 %v2192_v45, %v2481_v56 }
 0x399   : > { %v1084_v27 = vcombine.low %v1056_v23, %v1063_v24  ;;  %v1976_v31 = vcombine.high %v1056_v23, %v1063_v24  ;;  %v1100_v35 = vcombine.low %v1072_v25, %v1079_v26  ;;  %v1977_v28 = vcombine.high %v1072_v25, %v1079_v26 }
 0x39a   : > { %v1404_v62 = vpack.c.bf16 %v1400_v52, %v1400_v52 }
 0x39b   : > { %v1091_v29 = vrot.slane %v1084_v27, %v2410_v39  ;;  %v1099_v30 = vrot.slane %v1976_v31, %v2410_v39  ;;  %v1107_v32 = vrot.slane %v1100_v35, %v2410_v39  ;;  %v1115_v33 = vrot.slane %v1977_v28, %v2410_v39 }
 0x39d   : > { %v1116_v34 = vcombine.low %v1091_v29, %v1099_v30  ;;  %v1132_v36 = vcombine.low %v1107_v32, %v1115_v33  ;;  %v1117_v37 = vcombine.high %v1091_v29, %v1099_v30  ;;  %v1133_v38 = vcombine.high %v1107_v32, %v1115_v33 }
 0x39f   : > { %v1124_v41 = vrot.slane %v1116_v34, %v2413_v46  ;;  %v1140_v42 = vrot.slane %v1132_v36, %v2413_v46  ;;  %v1131_v43 = vrot.slane %v1117_v37, %v2413_v46  ;;  %v1147_v44 = vrot.slane %v1133_v38, %v2413_v46 }
 0x3a1   : > { %v1148_v47 = vcombine.low %v1124_v41, %v1140_v42  ;;  %v1149_v48 = vcombine.high %v1124_v41, %v1140_v42  ;;  %v1150_v49 = vcombine.low %v1131_v43, %v1147_v44  ;;  %v1151_v50 = vcombine.high %v1131_v43, %v1147_v44 }
 0x3a3   : > { %v1152_v53 = vpack.c.bf16 %v1148_v47, %v1148_v47  ;;  %v1153_v55 = vpack.c.bf16 %v1149_v48, %v1149_v48  ;;  %v1154_v59 = vpack.c.bf16 %v1150_v49, %v1150_v49  ;;  %v1155_v60 = vpack.c.bf16 %v1151_v50, %v1151_v50  ;;  %v2180_v50 = vld [vmem:[%s2599_s8 + $0x18] sm:$0xff]  }
 0x3a5   : > { %v1412_v57 = vsel %vm1410_vm5, %v1152_v53, 0  ;;  %v1458_v58 = vsel %vm1410_vm5, %v1153_v55, 0  ;;  %v1504_v54 = vsel %vm1410_vm5, %v1154_v59, 0  ;;  %v1550_v56 = vsel %vm1410_vm5, %v1155_v60, 0 }
 0x3a6   : > { %2095 = vmatpush3.bf16.msra.mxu0 %v1412_v57  ;;  %2101 = vmatpush3.bf16.msra.mxu1 %v1458_v58 }
 0x3a7   : > { %2106 = vmatprep.subr.bf16.mxu0 %v2223_v1  ;;  %2112 = vmatprep.subr.bf16.mxu1 %v2223_v1 }
 0x3a9   : > { %2097 = vmatmul.mubr.msk.bf16.vlgmr.msra.gmra.mrb[8].mxu0 %vm1358_vm4, %v1403_v61  ;;  %2103 = vmatmul.mubr.msk.bf16.vlgmr.msra.gmra.mrb[20].mxu1 %vm1358_vm4, %v1404_v62 }
 0x3aa   : > { %2107 = vmatpush3.bf16.msra.mxu0 %v1504_v54  ;;  %2113 = vmatpush3.bf16.msra.mxu1 %v1550_v56 }
 0x3ab   : > { %2108 = vmatprep.mubr.msk.bf16.mxu0 %vm2224_vm0, %v2223_v1  ;;  %2114 = vmatprep.mubr.msk.bf16.mxu1 %vm2224_vm0, %v2223_v1 }
 0x3ac   : > { %2118 = vmatprep.subr.bf16.mxu0 %v2223_v1 }
 0x3b9   : > { %v1391_v63 = vpop.xlane.xlu1 %1390 }
 0x3ba   : > { %2193 = vrcp.f32 %v1391_v63 }
 0x3c1   : > { %v1394_v2 = vpop.xlane.xlu0 %1393 }
 0x3c2   : > { %2195 = vrcp.f32 %v1394_v2 }
 0x3c4   : > { %v2194_v4 = vpop.eup %2193 }
 0x3c5   : > { %v1401_v5 = vmul.f32 %v2194_v4, %v2487_v0  ;;  %v2178_v0 = vld [vmem:[%s2599_s8 + $0x8] sm:$0xff]  }
 0x3c7   : > { %v1405_v6 = vpack.c.bf16 %v1401_v5, %v1401_v5 }
 0x3c9   : > { %2109 = vmatmul.mubr.msk.bf16.vlgmr.msra.gmra.mrb[12].mxu0 %vm1358_vm4, %v1405_v6 }
 0x3ca   : > { %2126 = vmatprep.mubr.msk.bf16.mxu0 %vm2224_vm0, %v2223_v1  ;;  %2119 = vmatpush3.bf16.msra.mxu0 %v2177_v11  ;;  %v1988_v11 = vld [vmem:[%s2600_s9] ss:$0 sm:$0xff] }
 0x3cb   : > { %2120 = vmatprep.subr.bf16.mxu0 %v2223_v1 }
 0x3cc   : > { %v2196_v7 = vpop.eup %2195 }
 0x3cd   : > { %v1402_v8 = vmul.f32 %v2196_v7, %v2491_v3 }
 0x3ce   : > { %2121 = vmatpush3.bf16.msra.mxu0 %v2178_v0 }
 0x3cf   : > { %v1406_v9 = vpack.c.bf16 %v1402_v8, %v1402_v8  ;;  %2122 = vmatprep.subr.bf16.mxu0 %v2223_v1 }
 0x3d1   : > { %2115 = vmatmul.mubr.msk.bf16.vlgmr.msra.gmra.mrb[24].mxu1 %vm1358_vm4, %v1406_v9 }
 0x3d2   : > { %2123 = vmatpush3.bf16.msra.mxu0 %v2179_v40 }
 0x3d3   : > { %2124 = vmatprep.subr.bf16.mxu0 %v2223_v1 }
 0x3d6   : > { %2125 = vmatpush3.bf16.msra.mxu0 %v2180_v50 }
 0x47c   : > { %v1448_v12 = vpop.f32.mrb[8].mxu0  ;;  %v1494_v13 = vpop.f32.mrb[20].mxu1 }
 0x47d   : > { %v2098_v3 = vpop.f32.mrb[9].mxu0  ;;  %v2104_v14 = vpop.f32.mrb[21].mxu1 }
 0x47e   : > { %v1451_v15 = vpop.f32.mrb[10].mxu0  ;;  %v1497_v16 = vpop.f32.mrb[22].mxu1 }
 0x47f   : > { %v2099_v17 = vpop.f32.mrb[11].mxu0  ;;  %v2105_v18 = vpop.f32.mrb[23].mxu1 }
 0x49c   : > { %v1540_v19 = vpop.f32.mrb[12].mxu0 }
 0x49d   : > { %v1592_v20 = vcombine.low %v1448_v12, %v1540_v19  ;;  %v1593_v21 = vcombine.high %v1448_v12, %v1540_v19  ;;  %v2110_v22 = vpop.f32.mrb[13].mxu0 }
 0x49e   : > { %v1543_v23 = vpop.f32.mrb[14].mxu0 }
 0x49f   : > { %v2111_v24 = vpop.f32.mrb[15].mxu0  ;;  %v1600_v28 = vrot.slane %v1592_v20, %v2410_v39  ;;  %v1607_v29 = vrot.slane %v1593_v21, %v2410_v39 }
 0x4a4   : > { %v1586_v25 = vpop.f32.mrb[24].mxu1 }
 0x4a5   : > { %v1608_v26 = vcombine.low %v1494_v13, %v1586_v25  ;;  %v1609_v27 = vcombine.high %v1494_v13, %v1586_v25  ;;  %v2116_v31 = vpop.f32.mrb[25].mxu1 }
 0x4a6   : > { %v1589_v35 = vpop.f32.mrb[26].mxu1 }
 0x4a7   : > { %v1616_v30 = vrot.slane %v1608_v26, %v2410_v39  ;;  %v1623_v32 = vrot.slane %v1609_v27, %v2410_v39  ;;  %v2117_v33 = vpop.f32.mrb[27].mxu1  ;;  %v1995_v27 = vld [vmem:[%s2602_s11] ss:$0 sm:$0xff] }
 0x4a9   : > { %v1624_v34 = vcombine.low %v1600_v28, %v1616_v30  ;;  %v1625_v36 = vcombine.high %v1600_v28, %v1616_v30  ;;  %v1640_v37 = vcombine.low %v1607_v29, %v1623_v32  ;;  %v1641_v38 = vcombine.high %v1607_v29, %v1623_v32 }
 0x4ab   : > { %v1632_v41 = vrot.slane %v1624_v34, %v2413_v46  ;;  %v1639_v42 = vrot.slane %v1625_v36, %v2413_v46  ;;  %v1648_v43 = vrot.slane %v1640_v37, %v2413_v46  ;;  %v1655_v44 = vrot.slane %v1641_v38, %v2413_v46 }
 0x4ad   : > { %v1660_v45 = vcombine.low %v1632_v41, %v1639_v42  ;;  %v1986_v47 = vcombine.high %v1632_v41, %v1639_v42  ;;  %v1676_v48 = vcombine.low %v1648_v43, %v1655_v44  ;;  %v1987_v49 = vcombine.high %v1648_v43, %v1655_v44 }
 0x4af   : > { %v1667_v51 = vrot.slane %v1660_v45, %v2410_v39  ;;  %v1675_v52 = vrot.slane %v1986_v47, %v2410_v39  ;;  %v1683_v53 = vrot.slane %v1676_v48, %v2410_v39  ;;  %v1691_v55 = vrot.slane %v1987_v49, %v2410_v39 }
 0x4b1   : > { %v1693_v57 = vcombine.high %v1667_v51, %v1675_v52  ;;  %v1709_v58 = vcombine.high %v1683_v53, %v1691_v55  ;;  %v1692_v1 = vcombine.low %v1667_v51, %v1675_v52  ;;  %v1708_v59 = vcombine.low %v1683_v53, %v1691_v55 }
 0x4b3   : > { %v1707_v60 = vrot.slane %v1693_v57, %v2413_v46  ;;  %v1723_v61 = vrot.slane %v1709_v58, %v2413_v46  ;;  %v1700_v62 = vrot.slane %v1692_v1, %v2413_v46  ;;  %v1716_v54 = vrot.slane %v1708_v59, %v2413_v46 }
 0x4b5   : > { %v1726_v56 = vcombine.low %v1707_v60, %v1723_v61  ;;  %v1725_v63 = vcombine.high %v1700_v62, %v1716_v54  ;;  %v1727_v2 = vcombine.high %v1707_v60, %v1723_v61  ;;  %v1724_v4 = vcombine.low %v1700_v62, %v1716_v54 }
 0x4b7   : > { %1733 = vrot.lane.b32.xlu1 %v1726_v56, %s2231_s30  ;;  %1729 = vrot.lane.b32.xlu0 %v1725_v63, %s2232_s13 }
 0x4bb   : > { %1737 = vrot.lane.b32.xlu1 %v1727_v2, %s2233_s14 }
 0x529   : > { %v1734_v39 = vpop.permute.xlu1 %1733  ;;  %v1730_v5 = vpop.permute.xlu0 %1729 }
 0x52a   : > { %v1740_v6 = vsel %vm1156_vm2, %v1724_v4, %v1730_v5 }
 0x52b   : > { %v1742_v8 = vsel %vm1741_vm6, %v1740_v6, %v1734_v39 }
 0x52d   : > { %v1738_v7 = vpop.permute.xlu1 %1737 }
 0x52e   : > { %v1744_v9 = vsel %vm1743_vm7, %v1742_v8, %v1738_v7 }
 0x52f   : > { %v1745_v46 = vpack.c.bf16 %v1744_v9, %v1744_v9 }
 0x531   : > { %2127 = vmatmul.mubr.msk.bf16.vlgmr.msra.gmra.mrb[16].mxu0 %vm501_vm1, %v1745_v46 }
 0x604   : > { %v1822_v0 = vpop.f32.mrb[16].mxu0 }
 0x605   : > { %v1823_v12 = vadd.f32 %v1988_v11, %v1822_v0  ;;  %v2128_v13 = vpop.f32.mrb[17].mxu0 }
 0x606   : > { %v1825_v3 = vpop.f32.mrb[18].mxu0 }
 0x607   : > { %v2129_v14 = vpop.f32.mrb[19].mxu0  ;;  %v1830_v15 = vadd.f32 %v1823_v12, %v2361_v10  ;;  %v1994_v10 = vld [vmem:[%s2601_s10] ss:$0 sm:$0xff] }
 0x609   : > { %v1831_v16 = vsel %vm501_vm1, %v1830_v15, 0.0 }
 0x60a   : > { %1832 = vadd.xlane.f32.xlu0 %v1831_v16 }
 0x697   : > { %v1833_v17 = vpop.xlane.xlu0 %1832 }
 0x698   : > { %v1835_v18 = vmul.f32 0.015625, %v1833_v17 }
 0x69a   : > { %v1836_v19 = vsub.f32 %v1830_v15, %v1835_v18 }
 0x69c   : > { %v1837_v20 = vmul.f32 %v1836_v19, %v1836_v19 }
 0x69e   : > { %v1838_v21 = vsel %vm501_vm1, %v1837_v20, 0.0 }
 0x69f   : > { %1839 = vadd.xlane.f32.xlu1 %v1838_v21 }
 0x72c   : > { %v1840_v22 = vpop.xlane.xlu1 %1839 }
 0x72d   : > { %v1841_v23 = vmul.f32 0.015625, %v1840_v22 }
 0x72f   : > { %v1842_v24 = vadd.f32 1e-05, %v1841_v23 }
 0x731   : > { %2197 = vrsqrt.f32 %v1842_v24 }
 0x73b   : > { %v2198_v25 = vpop.eup %2197 }
 0x73c   : > { %v1844_v26 = vmul.f32 %v2198_v25, %v1836_v19 }
 0x73e   : > { %v1851_v31 = vmul.f32 %v1994_v10, %v1844_v26 }
 0x740   : > { %v1858_v35 = vadd.f32 %v1995_v27, %v1851_v31 }
 0x742   : > { %1859 = vst.msk [vmem:[%s456_s28] sm:$0xff] %vm501_vm1, %v1858_v35 }
 0x743 PF: > { %s22_s23 = sadd.s32 1, %s2221_s23   ;;  %s2604_s21 = smov %s2217_s22 }
 0x744   : > { %p19_p5 = scmp.ge.s32.totalorder %s22_s23, 4   ;;  %s2605_s22 = smov %s2607_s24 }
 0x746   :  { %21 = sbr.rel (!%p19_p5) target bundleno = 2 (0x2), region = 101 }

</bundles_post_ra>
